<compile_context>
chip_gen: v6e
topology: v6e:2x2x1
jax: 0.10.0
libtpu: 0.0.40
codegen_flags: <defaults>
</compile_context>

<pallas_src>
import jax
import jax.numpy as jnp
from jax import lax
from jax.experimental import pallas as pl
from jax.experimental.pallas import tpu as pltpu


def _self_attention_kernel(q_ref, k_ref, v_ref, x_ref, gamma_ref,
                           out_ref, attn_ref):
    # q_ref     : (TQ, C)  bf16  projected queries for this tile (channel-last)
    # k_ref     : (C, N)   bf16  projected keys, all positions of this batch
    # v_ref     : (C, N)   bf16  projected values
    # x_ref     : (C, TQ)  f32   residual slice of the input (channel-first)
    # gamma_ref : (1,)     f32   scalar in SMEM
    # out_ref   : (C, TQ)  f32 ; attn_ref : (TQ, N) bf16
    energy = jnp.dot(q_ref[...], k_ref[...],
                     preferred_element_type=jnp.float32)            # (TQ, N)

    # Exact row softmax over all keys (this step sees the full key axis).
    m = jnp.max(energy, axis=-1, keepdims=True)
    e = jnp.exp(energy - m)
    inv = pl.reciprocal(jnp.sum(e, axis=-1, keepdims=True), approx=True)
    p = e * inv                                                     # (TQ, N) f32
    p_bf = p.astype(jnp.bfloat16)
    attn_ref[...] = p_bf                                            # bf16 store

    # out[c, t] = sum_m v[c, m] * p[t, m]  (contract the key axis of both).
    o = lax.dot_general(v_ref[...], p_bf,
                        dimension_numbers=(((1,), (1,)), ((), ())),
                        preferred_element_type=jnp.float32)         # (C, TQ)

    out_ref[...] = gamma_ref[0] * o + x_ref[...]


# ----------------------------- tiling helpers -------------------------------

def _tpu_vmem_capacity_bytes():
    try:
        return int(pltpu.get_tpu_info().vmem_capacity_bytes)
    except Exception:
        return 64 * 1024 * 1024            # conservative (v7x per-TC)


def _per_step_vmem_bytes(tq, n, c):
    """Approximate per-grid-step VMEM footprint of this kernel."""
    bf2, f4 = 2, 4
    # Double-buffered pipelined blocks (inputs + outputs).
    blocks = 2 * (tq * c * bf2        # q tile
                  + c * n * bf2       # k
                  + c * n * bf2       # v
                  + c * tq * f4       # x residual tile
                  + c * tq * f4       # out tile
                  + tq * n * bf2)     # attention tile
    # Live in-kernel intermediates: energy (f32), exp (f32), p_bf16.
    interm = tq * n * (f4 + f4 + bf2)
    return blocks + interm


def _pick_query_tile(n, c, vmem_budget_bytes):
    """Largest lane-dense query tile whose per-step footprint fits the budget.

    Prefers 512/256-wide tiles (fills the 256x256 MXUs on v6e/v7x and gives
    long writeback bursts); 128 is the floor (one full vreg lane width)."""
    if n % 128 != 0:
        return n                      # tiny / unaligned shapes: single tile
    for tq in (512, 256, 128):
        if n % tq == 0 and _per_step_vmem_bytes(tq, n, c) <= vmem_budget_bytes:
            return tq
    return 128


# ------------------------------ public wrapper ------------------------------

def self_attention_pallas(x_nchw, wq, wk, wv, bq, bk, bv, gamma, *, tq=None):
    """x_nchw: (B, C, W, H) float32.

    Returns (out (B, C, W, H) float32, attention (B, N, N) bfloat16)."""
    B, C, W, H = x_nchw.shape
    N = W * H

    vmem_cap = _tpu_vmem_capacity_bytes()
    if tq is None:
        tq = _pick_query_tile(N, C, int(0.70 * vmem_cap))
    assert N % tq == 0, (N, tq)
    n_qt = N // tq

    x_cf = x_nchw.reshape(B, C, N).astype(jnp.float32)    # channel-first (free)

    wq_f = jnp.asarray(wq, jnp.float32)
    wk_f = jnp.asarray(wk, jnp.float32)
    wv_f = jnp.asarray(wv, jnp.float32)
    bq_f = jnp.asarray(bq, jnp.float32)
    bk_f = jnp.asarray(bk, jnp.float32)
    bv_f = jnp.asarray(bv, jnp.float32)

    # 1x1 convolutions == channel matmuls.  Done ONCE here in f32 (bias in
    # f32), stored bf16 for the MXU -- the kernel never redoes this work.
    q = jnp.einsum('oc,bcn->bno', wq_f, x_cf) + bq_f[None, None, :]   # (B, N, C)
    k = jnp.einsum('oc,bcn->bon', wk_f, x_cf) + bk_f[None, :, None]   # (B, C, N)
    v = jnp.einsum('oc,bcn->bon', wv_f, x_cf) + bv_f[None, :, None]   # (B, C, N)
    q = q.astype(jnp.bfloat16)
    k = k.astype(jnp.bfloat16)
    v = v.astype(jnp.bfloat16)
    gamma1 = jnp.asarray(gamma, jnp.float32).reshape(1)

    footprint = _per_step_vmem_bytes(tq, N, C)
    vmem_limit = int(min(max(footprint + (16 << 20), 32 << 20),
                         vmem_cap - (4 << 20)))

    grid_spec = pltpu.PrefetchScalarGridSpec(
        num_scalar_prefetch=0,
        grid=(B, n_qt),
        in_specs=[
            pl.BlockSpec((None, tq, C), lambda b, qi: (b, qi, 0)),   # q tile
            pl.BlockSpec((None, C, N), lambda b, qi: (b, 0, 0)),     # k (per batch)
            pl.BlockSpec((None, C, N), lambda b, qi: (b, 0, 0)),     # v (per batch)
            pl.BlockSpec((None, C, tq), lambda b, qi: (b, 0, qi)),   # x residual tile
            pl.BlockSpec(memory_space=pltpu.SMEM),                   # gamma scalar
        ],
        out_specs=[
            pl.BlockSpec((None, C, tq), lambda b, qi: (b, 0, qi)),   # out (B, C, N)
            pl.BlockSpec((None, tq, N), lambda b, qi: (b, qi, 0)),   # attention rows
        ],
    )

    out_cf, attn = pl.pallas_call(
        _self_attention_kernel,
        out_shape=(
            jax.ShapeDtypeStruct((B, C, N), jnp.float32),
            jax.ShapeDtypeStruct((B, N, N), jnp.bfloat16),
        ),
        grid_spec=grid_spec,
        compiler_params=pltpu.CompilerParams(
            # Both axes independent -> megacore sharding on v7x even at B<=2.
            dimension_semantics=("parallel", "parallel"),
            vmem_limit_bytes=vmem_limit),
    )(q, k, v, x_cf, gamma1)

    # (B, C, N) -> NCHW is a free reshape (no transpose).
    return out_cf.reshape(B, C, W, H), attn


# ----- deterministic parameter init + spectral norm (plain-JAX glue) --------

def _l2normalize(v, eps=1e-12):
    return v / (jnp.linalg.norm(v) + eps)


def spectral_norm_weight(w2d, key, power_iterations=1):
    """One power iteration on the (out, in) weight matrix, as in SAGAN SpectralNorm."""
    # TODO(synk): parameter-side spectral norm is plain JAX, not a Pallas kernel.
    out_dim, in_dim = w2d.shape
    u = _l2normalize(jax.random.normal(key, (out_dim,), jnp.float32))
    v = jnp.zeros((in_dim,), jnp.float32)
    for _ in range(power_iterations):
        v = _l2normalize(w2d.T @ u)
        u = _l2normalize(w2d @ v)
    sigma = u @ (w2d @ v)
    return w2d / sigma


def init_params(key, in_dim):
    C = in_dim
    keys = jax.random.split(key, 7)
    # nn.Conv2d default init: uniform(-k, k), k = 1/sqrt(fan_in), fan_in = C*1*1
    bound = 1.0 / jnp.sqrt(jnp.asarray(C, jnp.float32))

    def conv_w(k):
        return jax.random.uniform(k, (C, C), jnp.float32, -bound, bound)

    def conv_b(k):
        return jax.random.uniform(k, (C,), jnp.float32, -bound, bound)

    wq = spectral_norm_weight(conv_w(keys[0]), keys[3])
    wk = spectral_norm_weight(conv_w(keys[1]), keys[4])
    wv = spectral_norm_weight(conv_w(keys[2]), keys[5])
    bq = conv_b(keys[6])
    bk = conv_b(jax.random.fold_in(keys[6], 1))
    bv = conv_b(jax.random.fold_in(keys[6], 2))
    # gamma initialized to zero in the module; use a nonzero value so the
    # attention branch actually contributes in this synthetic test.
    gamma = jnp.asarray(0.5, jnp.float32)
    return wq, wk, wv, bq, bk, bv, gamma


def reference(x_nchw, wq, wk, wv, bq, bk, bv, gamma):
    """Pure-jnp f32 reference matching the PyTorch forward."""
    B, C, W, H = x_nchw.shape
    N = W * H
    x = x_nchw.reshape(B, C, N)
    q = jnp.einsum('oc,bcn->bon', wq, x) + bq[None, :, None]
    k = jnp.einsum('oc,bcn->bon', wk, x) + bk[None, :, None]
    v = jnp.einsum('oc,bcn->bon', wv, x) + bv[None, :, None]
    energy = jnp.einsum('bcn,bcm->bnm', q, k)          # (B, N, N)
    attn = jax.nn.softmax(energy, axis=-1)
    out = jnp.einsum('bcm,bnm->bcn', v, attn)          # (B, C, N)
    out = gamma * out + x
    return out.reshape(B, C, W, H), attn


if __name__ == "__main__":
    key = jax.random.PRNGKey(0)
    k_x, k_p = jax.random.split(key)

    B, C, W, H = 2, 4, 16, 16          # N = 256
    x = jax.random.normal(k_x, (B, C, W, H), jnp.float32)
    wq, wk, wv, bq, bk, bv, gamma = init_params(k_p, C)

    out, attn = self_attention_pallas(x, wq, wk, wv, bq, bk, bv, gamma)
    out = jax.block_until_ready(out)
    attn = jax.block_until_ready(attn)

    out_ref, attn_ref = reference(x, wq, wk, wv, bq, bk, bv, gamma)
    assert out.shape == (B, C, W, H) and attn.shape == (B, W * H, W * H)
    # bf16 matmul inputs, bf16 attention output, and the approximate
    # reciprocal give a slightly looser tolerance than the pure-f32 reference.
    attn_f32 = attn.astype(jnp.float32)
    assert jnp.allclose(attn_f32, attn_ref, atol=2e-2, rtol=2e-2), \
        float(jnp.max(jnp.abs(attn_f32 - attn_ref)))
    assert jnp.allclose(out, out_ref, atol=2e-2, rtol=2e-2), \
        float(jnp.max(jnp.abs(out - out_ref)))

    print("KERNEL_OK")
</pallas_src>

<mosaic_0001>
module attributes {stable_mosaic.version = 11 : i64} {
  func.func @_self_attention_kernel(%arg0: i32, %arg1: i32, %arg2: memref<1x256x4xbf16, #tpu.memory_space<vmem>>, %arg3: memref<1x4x256xbf16, #tpu.memory_space<vmem>>, %arg4: memref<1x4x256xbf16, #tpu.memory_space<vmem>>, %arg5: memref<1x4x256xf32, #tpu.memory_space<vmem>>, %arg6: memref<1xf32, #tpu.memory_space<smem>>, %arg7: memref<1x4x256xf32, #tpu.memory_space<vmem>>, %arg8: memref<1x256x256xbf16, #tpu.memory_space<vmem>>) attributes {dimension_semantics = [#tpu.dimension_semantics<parallel>, #tpu.dimension_semantics<parallel>], iteration_bounds = array<i64: 2, 1>, scalar_prefetch = 0 : i64, scratch_operands = 0 : i64, tpu.core_type = #tpu.core_type<tc>, window_params = [{transform_indices = @transform_0, window_bounds = array<i64: 1, 256, 4>}, {transform_indices = @transform_1, window_bounds = array<i64: 1, 4, 256>}, {transform_indices = @transform_2, window_bounds = array<i64: 1, 4, 256>}, {transform_indices = @transform_3, window_bounds = array<i64: 1, 4, 256>}, {transform_indices = @transform_4, window_bounds = array<i64: 1>}, {transform_indices = @transform_5, window_bounds = array<i64: 1, 4, 256>}, {transform_indices = @transform_6, window_bounds = array<i64: 1, 256, 256>}]} {
    %c0 = arith.constant 0 : index
    %c0_0 = arith.constant 0 : index
    %c0_1 = arith.constant 0 : index
    %0 = vector.load %arg2[%c0, %c0_0, %c0_1] : memref<1x256x4xbf16, #tpu.memory_space<vmem>>, vector<1x256x4xbf16>
    %1 = vector.shape_cast %0 : vector<1x256x4xbf16> to vector<256x4xbf16>
    %c0_2 = arith.constant 0 : index
    %c0_3 = arith.constant 0 : index
    %c0_4 = arith.constant 0 : index
    %2 = vector.load %arg3[%c0_2, %c0_3, %c0_4] : memref<1x4x256xbf16, #tpu.memory_space<vmem>>, vector<1x4x256xbf16>
    %3 = vector.shape_cast %2 : vector<1x4x256xbf16> to vector<4x256xbf16>
    %cst = arith.constant dense<0.000000e+00> : vector<256x256xf32>
    %4 = tpu.matmul %1, %3, %cst {dimension_numbers = #tpu.dot_dimension_numbers<[1], [0], [0], [1], [0, 0, 1, 1], [], []>} : vector<256x4xbf16>, vector<4x256xbf16>, vector<256x256xf32> -> vector<256x256xf32>
    %cst_5 = arith.constant dense<0xFF800000> : vector<256xf32>
    %5 = vector.multi_reduction <maximumf>, %4, %cst_5 [1] : vector<256x256xf32> to vector<256xf32>
    %6 = vector.shape_cast %5 : vector<256xf32> to vector<256x1xf32>
    %7 = vector.broadcast %6 : vector<256x1xf32> to vector<256x256xf32>
    %8 = arith.subf %4, %7 : vector<256x256xf32>
    %9 = math.exp %8 : vector<256x256xf32>
    %cst_6 = arith.constant dense<0.000000e+00> : vector<256xf32>
    %10 = vector.multi_reduction <add>, %9, %cst_6 [1] : vector<256x256xf32> to vector<256xf32>
    %11 = vector.shape_cast %10 : vector<256xf32> to vector<256x1xf32>
    %12 = tpu.reciprocal %11 {approx = true} : vector<256x1xf32> -> vector<256x1xf32>
    %13 = vector.broadcast %12 : vector<256x1xf32> to vector<256x256xf32>
    %14 = arith.mulf %9, %13 : vector<256x256xf32>
    %15 = arith.truncf %14 : vector<256x256xf32> to vector<256x256xbf16>
    %c0_7 = arith.constant 0 : index
    %c0_8 = arith.constant 0 : index
    %c0_9 = arith.constant 0 : index
    %16 = vector.load %arg8[%c0_7, %c0_8, %c0_9] : memref<1x256x256xbf16, #tpu.memory_space<vmem>>, vector<1x256x256xbf16>
    %17 = vector.shape_cast %16 : vector<1x256x256xbf16> to vector<256x256xbf16>
    %18 = vector.shape_cast %15 : vector<256x256xbf16> to vector<1x256x256xbf16>
    tpu.vector_store %arg8[%c0_7, %c0_8, %c0_9], %18 {strides = array<i32>} : memref<1x256x256xbf16, #tpu.memory_space<vmem>>, vector<1x256x256xbf16>,
    %c0_10 = arith.constant 0 : index
    %c0_11 = arith.constant 0 : index
    %c0_12 = arith.constant 0 : index
    %19 = vector.load %arg4[%c0_10, %c0_11, %c0_12] : memref<1x4x256xbf16, #tpu.memory_space<vmem>>, vector<1x4x256xbf16>
    %20 = vector.shape_cast %19 : vector<1x4x256xbf16> to vector<4x256xbf16>
    %cst_13 = arith.constant dense<0.000000e+00> : vector<4x256xf32>
    %21 = tpu.matmul %20, %15, %cst_13 {dimension_numbers = #tpu.dot_dimension_numbers<[1], [1], [0], [0], [0, 0, 1, 0], [], []>} : vector<4x256xbf16>, vector<256x256xbf16>, vector<4x256xf32> -> vector<4x256xf32>
    %c0_14 = arith.constant 0 : index
    %22 = memref.load %arg6[%c0_14] : memref<1xf32, #tpu.memory_space<smem>>
    %23 = vector.broadcast %22 : f32 to vector<4x256xf32>
    %24 = arith.mulf %23, %21 : vector<4x256xf32>
    %c0_15 = arith.constant 0 : index
    %c0_16 = arith.constant 0 : index
    %c0_17 = arith.constant 0 : index
    %25 = vector.load %arg5[%c0_15, %c0_16, %c0_17] : memref<1x4x256xf32, #tpu.memory_space<vmem>>, vector<1x4x256xf32>
    %26 = vector.shape_cast %25 : vector<1x4x256xf32> to vector<4x256xf32>
    %27 = arith.addf %24, %26 : vector<4x256xf32>
    %c0_18 = arith.constant 0 : index
    %c0_19 = arith.constant 0 : index
    %c0_20 = arith.constant 0 : index
    %28 = vector.load %arg7[%c0_18, %c0_19, %c0_20] : memref<1x4x256xf32, #tpu.memory_space<vmem>>, vector<1x4x256xf32>
    %29 = vector.shape_cast %28 : vector<1x4x256xf32> to vector<4x256xf32>
    %30 = vector.shape_cast %27 : vector<4x256xf32> to vector<1x4x256xf32>
    tpu.vector_store %arg7[%c0_18, %c0_19, %c0_20], %30 {strides = array<i32>} : memref<1x4x256xf32, #tpu.memory_space<vmem>>, vector<1x4x256xf32>,
    return
  }
  func.func @transform_0(%arg0: i32, %arg1: i32) -> (i32, i32, i32) {
    %c0_i32 = arith.constant 0 : i32
    %c0_i32_0 = arith.constant 0 : i32
    return %arg0, %arg1, %c0_i32 : i32, i32, i32
  }
  func.func @transform_1(%arg0: i32, %arg1: i32) -> (i32, i32, i32) {
    %c0_i32 = arith.constant 0 : i32
    %c0_i32_0 = arith.constant 0 : i32
    %c0_i32_1 = arith.constant 0 : i32
    return %arg0, %c0_i32, %c0_i32_0 : i32, i32, i32
  }
  func.func @transform_2(%arg0: i32, %arg1: i32) -> (i32, i32, i32) {
    %c0_i32 = arith.constant 0 : i32
    %c0_i32_0 = arith.constant 0 : i32
    %c0_i32_1 = arith.constant 0 : i32
    return %arg0, %c0_i32, %c0_i32_0 : i32, i32, i32
  }
  func.func @transform_3(%arg0: i32, %arg1: i32) -> (i32, i32, i32) {
    %c0_i32 = arith.constant 0 : i32
    %c0_i32_0 = arith.constant 0 : i32
    return %arg0, %c0_i32, %arg1 : i32, i32, i32
  }
  func.func @transform_4(%arg0: i32, %arg1: i32) -> i32 {
    %c0_i32 = arith.constant 0 : i32
    %c0_i32_0 = arith.constant 0 : i32
    return %c0_i32 : i32
  }
  func.func @transform_5(%arg0: i32, %arg1: i32) -> (i32, i32, i32) {
    %c0_i32 = arith.constant 0 : i32
    %c0_i32_0 = arith.constant 0 : i32
    return %arg0, %c0_i32, %arg1 : i32, i32, i32
  }
  func.func @transform_6(%arg0: i32, %arg1: i32) -> (i32, i32, i32) {
    %c0_i32 = arith.constant 0 : i32
    %c0_i32_0 = arith.constant 0 : i32
    return %arg0, %arg1, %c0_i32 : i32, i32, i32
  }
}

</mosaic_0001>

<bundles_post_ra>
// kernel: tpu_custom_call.1
= control target key start
LH: loop header
LB: loop body
LE: loop exit
PB: predicated region body
PF: predicated region fallthrough
CT: control target
= control target key end

     0   :  { %s3000_s0 = inlined_call_operand.vmem [shape: bf16[2,256,4], index: 0, kind: input, shape index: {}]   ;;  %s3001_s1 = inlined_call_operand.vmem [shape: bf16[2,4,256], index: 1, kind: input, shape index: {}]   ;;  %s3002_s2 = inlined_call_operand.vmem [shape: bf16[2,4,256], index: 2, kind: input, shape index: {}]   ;;  %s3003_s3 = inlined_call_operand.vmem [shape: f32[2,4,256], index: 3, kind: input, shape index: {}]   ;;  %s3004_s4 = inlined_call_operand.<no memory space> [shape: f32[1], index: 4, kind: input, shape index: {}]   ;;  %s3005_s5 = inlined_call_operand.hbm [shape: f32[2,4,256], index: 5, kind: output, shape index: {0}]   ;;  %s3006_s6 = inlined_call_operand.hbm [shape: bf16[2,256,256], index: 6, kind: output, shape index: {1}]  }
   0x1   :  { %12 = sst [smem:[#allocation2]] %s3004_s4 }
   0x2   :  { %13 = vsyncpa [#allocation4], 0 }
   0x3   :  { %15 = vsyncpa [#allocation4 + $0x1], 0 }
   0x4   :  { %16 = vsyncpa [#allocation6], 0 }
   0x5   :  { %18 = vsyncpa [#allocation6 + $0x1], 0  ;;  %s2261_s23 = smov 0   ;;  %s2263_s24 = smov 0  }
   0x6   :  { %s2265_s25 = smov 0   ;;  %s2267_s26 = smov 0  }
   0x7   :  { %s2269_s27 = smov 0   ;;  %s2271_s28 = smov 0  }
   0x8 LB: > { %s1710_s4 = sadd.s32 4294967295, %s2216_s28   ;;  %s1711_s29 = sadd.s32 4294967294, %s2216_s28   ;;  %s2216_s28 = sphi %s2271_s28, %s24_s28   ;;  %s2212_s27 = sphi %s2269_s27, %s3097_s27   ;;  %s2208_s26 = sphi %s2267_s26, %s3096_s26   ;;  %s2204_s25 = sphi %s2265_s25, %s3095_s25   ;;  %s2200_s24 = sphi %s2263_s24, %s3094_s24   ;;  %s2196_s23 = sphi %s2261_s23, %s3093_s23  }
   0x9   : > { %s36_s30 = sadd.s32 1, %s2212_s27  ;;  %s174_s7 = sadd.s32 1, %s2204_s25 }
   0xa   : > { %p38_p0 = scmp.ge.s32.totalorder %s36_s30, 2  ;;  %p184_p1 = scmp.ne.s32.totalorder %s2204_s25, %s2200_s24 }
   0xb   : > { %p185_p2 = scmp.eq.s32.totalorder %s1710_s4, 1  ;;  %p190_p3 = scmp.ne.s32.totalorder %s2200_s24, %s2196_s23 }
   0xc   : > { %s3099_s30 = smov (%p38_p0, %s36_s30), 0  ;;  %p191_p5 = scmp.eq.s32.totalorder %s1711_s29, 1 }
   0xd   : > { %p2301_p4 = por %p185_p2, %p184_p1  ;;  %s169_s9 = ssub.s32 %s2212_s27, %s3099_s30 }
   0xe   : > { %p1714_p6 = scmp.ge.s32.totalorder %s2216_s28, 1  ;;  %p172_p7 = scmp.eq.s32.totalorder %s169_s9, 0 }
   0xf   : > { %p2308_p8 = por %p191_p5, %p190_p3  ;;  %p282_p9 = scmp.lt.s32.totalorder %s2216_s28, 3 }
  0x10   : > { %s2314_s11 = scalar_select %p172_p7, %s2204_s25, %s174_s7  }
  0x11   : > { %p283_p10 = pnand %p1714_p6, %p282_p9 }
  0x13   : > { %286 = sbr.rel (%p283_p10) target bundleno = 1019 (0x3fb), region = 40 }
  0x18   : > { %p341_p11 = scmp.lt.s32.totalorder %s2208_s26, 1  ;;  %v2218_v0 = vmov 0   ;;  %vm544_vm0 = vcmask 1041408   ;;  %vm495_vm1 = vcmask 31744   ;;  %s2753_s21 = sand.u32 1, %s2200_s24  }
  0x19   : > { %583 = vmatprep.mubr.bf16.mxu0 %v2218_v0  ;;  %s1716_s22 = sshll.u32 %s2753_s21, 8  ;;  %s1522_s18 = scalar_lea.sflag [#allocation6], %s2753_s21 }
  0x1a   : > { %s2318_s12 = scalar_select %p341_p11, %s2208_s26, 1 }
  0x1b   : > { %s2764_s4 = scalar_lea.vmem [#allocation5], %s1716_s22 }
  0x1c   : > { %s1800_s13 = sshll.u32 %s2318_s12, 7  ;;  %s1801_s14 = sshll.u32 %s2318_s12, 2 }
  0x1d   : > { %s2325_s17 = scalar_lea.vmem %s3000_s0, %s1800_s13  ;;  %s354_s20 = scalar_lea.vmem %s3001_s1, %s1801_s14 }
  0x1e   : > { %v1741_v1 = vld.sshfl [vmem:[%s354_s20] sm:$0x33 pattern:$0x76325410]  ;;  %v1902_v5 = vld [vmem:[%s2325_s17 + $0x8] sm:$0xff]   ;;  %v1903_v6 = vld [vmem:[%s2325_s17 + $0x10] sm:$0xff]   ;;  %s359_s9 = scalar_lea.vmem %s3002_s2, %s1801_s14 }
  0x1f   : > { %v494_v2 = vcombine.high %v1741_v1, %v1741_v1  ;;  %v546_v3 = vsel %vm544_vm0, %v1741_v1, 0  ;;  %v1901_v4 = vld [vmem:[%s2325_s17] sm:$0xff]   ;;  %v1904_v7 = vld [vmem:[%s2325_s17 + $0x18] sm:$0xff]   ;;  %v1906_v9 = vld [vmem:[%s2325_s17 + $0x28] sm:$0xff]   ;;  %s1837_s13 = sshll.u32 %s2208_s26, 12  ;;  %s1554_s14 = sshll.u32 %s2764_s4, 4  ;;  %s2931_s14 = int_to_ptr.vmem [resolvable:$true] %s1554_s14 }
  0x20   : > { %v1905_v8 = vld [vmem:[%s2325_s17 + $0x20] sm:$0xff]   ;;  %v1907_v10 = vld [vmem:[%s2325_s17 + $0x30] sm:$0xff]   ;;  %v1908_v11 = vld [vmem:[%s2325_s17 + $0x38] sm:$0xff]   ;;  %s2110_s19 = scalar_lea.vmem %s2931_s14, 4096  ;;  %s2219_s20 = smov [#allocation5]  }
  0x21   : > { %1742 = vmatprep.subr.msk.bf16.mxu0 %vm544_vm0, %v494_v2  ;;  %v1909_v12 = vld [vmem:[%s2325_s17 + $0x40] sm:$0xff]   ;;  %v1910_v13 = vld [vmem:[%s2325_s17 + $0x48] sm:$0xff]   ;;  %v1911_v14 = vld [vmem:[%s2325_s17 + $0x50] sm:$0xff]   ;;  %p2111_p12 = scmp.ne.s32.totalorder %s2931_s14, %s2110_s19  ;;  %s2114_s22 = sshll.u32 %s2219_s20, 4  ;;  %s2115_s22 = int_to_ptr.vmem [resolvable:$false] %s2114_s22 }
  0x22   : > { %566 = vmatpush1.bf16.msra.mxu0 %v546_v3  ;;  %v1912_v15 = vld [vmem:[%s2325_s17 + $0x58] sm:$0xff]   ;;  %v1913_v16 = vld [vmem:[%s2325_s17 + $0x60] sm:$0xff]   ;;  %v1914_v17 = vld [vmem:[%s2325_s17 + $0x68] sm:$0xff]   ;;  %p2117_p1 = scmp.lt.s32.totalorder %s2931_s14, %s2115_s22 }
  0x23   : > { %v1915_v18 = vld [vmem:[%s2325_s17 + $0x70] sm:$0xff]   ;;  %v1916_v19 = vld [vmem:[%s2325_s17 + $0x78] sm:$0xff]   ;;  %s2929_s17 = scalar_lea.hbm %s3006_s6, %s1837_s13  ;;  %p2112_p13 = pnand %p2111_p12, %p2301_p4 }
  0x25   : > { %1743 = vmatmul.mubr.msk.bf16.vlgmr.msra.gmra.mxu0 %vm495_vm1, %v1901_v4  ;;  %p2113_p0 = pneg %p2112_p13 }
  0x26   : > { %593 = vmatprep.mubr.bf16.mxu0 %v2218_v0 }
  0x2d   : > { %1744 = vmatmul.mubr.msk.bf16.gmra.mxu0 %vm495_vm1, %v1902_v5 }
  0x2e   : > { %603 = vmatprep.mubr.bf16.mxu0 %v2218_v0 }
  0x35   : > { %1745 = vmatmul.mubr.msk.bf16.gmra.mxu0 %vm495_vm1, %v1903_v6 }
  0x36   : > { %613 = vmatprep.mubr.bf16.mxu0 %v2218_v0 }
  0x3d   : > { %1746 = vmatmul.mubr.msk.bf16.gmra.mxu0 %vm495_vm1, %v1904_v7 }
  0x3e   : > { %623 = vmatprep.mubr.bf16.mxu0 %v2218_v0 }
  0x45   : > { %1747 = vmatmul.mubr.msk.bf16.gmra.mxu0 %vm495_vm1, %v1905_v8 }
  0x46   : > { %633 = vmatprep.mubr.bf16.mxu0 %v2218_v0 }
  0x4d   : > { %1748 = vmatmul.mubr.msk.bf16.gmra.mxu0 %vm495_vm1, %v1906_v9 }
  0x4e   : > { %643 = vmatprep.mubr.bf16.mxu0 %v2218_v0 }
  0x55   : > { %1749 = vmatmul.mubr.msk.bf16.gmra.mxu0 %vm495_vm1, %v1907_v10 }
  0x56   : > { %653 = vmatprep.mubr.bf16.mxu0 %v2218_v0 }
  0x5d   : > { %1750 = vmatmul.mubr.msk.bf16.gmra.mxu0 %vm495_vm1, %v1908_v11 }
  0x5e   : > { %663 = vmatprep.mubr.bf16.mxu0 %v2218_v0 }
  0x65   : > { %1751 = vmatmul.mubr.msk.bf16.gmra.mxu0 %vm495_vm1, %v1909_v12 }
  0x66   : > { %673 = vmatprep.mubr.bf16.mxu0 %v2218_v0 }
  0x6d   : > { %1752 = vmatmul.mubr.msk.bf16.gmra.mxu0 %vm495_vm1, %v1910_v13 }
  0x6e   : > { %683 = vmatprep.mubr.bf16.mxu0 %v2218_v0 }
  0x75   : > { %1753 = vmatmul.mubr.msk.bf16.gmra.mxu0 %vm495_vm1, %v1911_v14 }
  0x76   : > { %693 = vmatprep.mubr.bf16.mxu0 %v2218_v0 }
  0x7d   : > { %1754 = vmatmul.mubr.msk.bf16.gmra.mxu0 %vm495_vm1, %v1912_v15 }
  0x7e   : > { %703 = vmatprep.mubr.bf16.mxu0 %v2218_v0 }
  0x85   : > { %1755 = vmatmul.mubr.msk.bf16.gmra.mxu0 %vm495_vm1, %v1913_v16 }
  0x86   : > { %713 = vmatprep.mubr.bf16.mxu0 %v2218_v0 }
  0x8d   : > { %1756 = vmatmul.mubr.msk.bf16.gmra.mxu0 %vm495_vm1, %v1914_v17 }
  0x8e   : > { %723 = vmatprep.mubr.bf16.mxu0 %v2218_v0 }
  0x95   : > { %1757 = vmatmul.mubr.msk.bf16.gmra.mxu0 %vm495_vm1, %v1915_v18 }
  0x96   : > { %733 = vmatprep.mubr.bf16.mxu0 %v2218_v0 }
  0x9d   : > { %1758 = vmatmul.mubr.msk.bf16.gmra.mxu0 %vm495_vm1, %v1916_v19 }
  0xe5   : > { %v2364_v20 = vpop.f32.mrf.mxu0 }
  0xe7   : > { %v2366_v21 = vpop.f32.mrf.mxu0 }
  0xe8   : > { %v744_v15 = vmax.f32 %v2364_v20, %v2366_v21 }
  0xe9   : > { %v2368_v22 = vpop.f32.mrf.mxu0 }
  0xeb   : > { %v2370_v23 = vpop.f32.mrf.mxu0 }
  0xec   : > { %3037 = vst [vmem:[#allocation9_spill] sm:$0xff] %v2370_v23  ;;  %v747_v8 = vmax.f32 %v2368_v22, %v2370_v23 }
  0xed   : > { %v2372_v24 = vpop.f32.mrf.mxu0 }
  0xef   : > { %v2374_v25 = vpop.f32.mrf.mxu0 }
  0xf0   : > { %v750_v12 = vmax.f32 %v2372_v24, %v2374_v25 }
  0xf1   : > { %v2376_v26 = vpop.f32.mrf.mxu0 }
  0xf3   : > { %v2378_v27 = vpop.f32.mrf.mxu0 }
  0xf4   : > { %v753_v4 = vmax.f32 %v2376_v26, %v2378_v27 }
  0xf5   : > { %v2380_v28 = vpop.f32.mrf.mxu0 }
  0xf7   : > { %v2382_v29 = vpop.f32.mrf.mxu0 }
  0xf8   : > { %v756_v9 = vmax.f32 %v2380_v28, %v2382_v29 }
  0xf9   : > { %v2384_v30 = vpop.f32.mrf.mxu0 }
  0xfb   : > { %v2386_v31 = vpop.f32.mrf.mxu0 }
  0xfc   : > { %v759_v0 = vmax.f32 %v2384_v30, %v2386_v31 }
  0xfd   : > { %v2388_v32 = vpop.f32.mrf.mxu0 }
  0xff   : > { %v2390_v33 = vpop.f32.mrf.mxu0 }
 0x100   : > { %v762_v5 = vmax.f32 %v2388_v32, %v2390_v33 }
 0x101   : > { %v2392_v34 = vpop.f32.mrf.mxu0 }
 0x103   : > { %v2394_v35 = vpop.f32.mrf.mxu0 }
 0x104   : > { %v765_v60 = vmax.f32 %v2392_v34, %v2394_v35 }
 0x105   : > { %v2396_v36 = vpop.f32.mrf.mxu0 }
 0x107   : > { %v2398_v37 = vpop.f32.mrf.mxu0 }
 0x108   : > { %v768_v1 = vmax.f32 %v2396_v36, %v2398_v37 }
 0x109   : > { %v2400_v38 = vpop.f32.mrf.mxu0 }
 0x10b   : > { %v2402_v39 = vpop.f32.mrf.mxu0 }
 0x10c   : > { %v771_v56 = vmax.f32 %v2400_v38, %v2402_v39 }
 0x10d   : > { %v2404_v40 = vpop.f32.mrf.mxu0 }
 0x10f   : > { %v2406_v41 = vpop.f32.mrf.mxu0 }
 0x110   : > { %v774_v61 = vmax.f32 %v2404_v40, %v2406_v41 }
 0x111   : > { %v2408_v42 = vpop.f32.mrf.mxu0 }
 0x113   : > { %v2410_v43 = vpop.f32.mrf.mxu0 }
 0x114   : > { %v777_v52 = vmax.f32 %v2408_v42, %v2410_v43 }
 0x115   : > { %v2412_v44 = vpop.f32.mrf.mxu0 }
 0x117   : > { %v2414_v45 = vpop.f32.mrf.mxu0 }
 0x118   : > { %v780_v46 = vmax.f32 %v2412_v44, %v2414_v45 }
 0x119   : > { %v2418_v47 = vpop.f32.mrf.mxu0 }
 0x11a   : > { %781 = vmax.xlane.f32.xlu1 %v780_v46 }
 0x11b   : > { %v2420_v48 = vpop.f32.mrf.mxu0 }
 0x11c   : > { %v783_v49 = vmax.f32 %v2418_v47, %v2420_v48 }
 0x11d   : > { %v2424_v50 = vpop.f32.mrf.mxu0 }
 0x11e   : > { %784 = vmax.xlane.f32.xlu1 %v783_v49 }
 0x11f   : > { %v2426_v51 = vpop.f32.mrf.mxu0 }
 0x120   : > { %v786_v53 = vmax.f32 %v2424_v50, %v2426_v51 }
 0x121   : > { %v2432_v54 = vpop.f32.mrf.mxu0 }
 0x122   : > { %778 = vmax.xlane.f32.xlu1 %v777_v52  ;;  %787 = vmax.xlane.f32.xlu0 %v786_v53 }
 0x123   : > { %v2434_v55 = vpop.f32.mrf.mxu0 }
 0x124   : > { %v789_v57 = vmax.f32 %v2432_v54, %v2434_v55 }
 0x125   : > { %v2440_v58 = vpop.f32.mrf.mxu0 }
 0x126   : > { %3038 = vst [vmem:[#allocation10_spill] sm:$0xff] %v2440_v58  ;;  %772 = vmax.xlane.f32.xlu1 %v771_v56  ;;  %790 = vmax.xlane.f32.xlu0 %v789_v57 }
 0x127   : > { %v2442_v59 = vpop.f32.mrf.mxu0 }
 0x128   : > { %3039 = vst [vmem:[#allocation11_spill] sm:$0xff] %v2442_v59 }
 0x129   : > { %v2448_v62 = vpop.f32.mrf.mxu0 }
 0x12a   : > { %3040 = vst [vmem:[#allocation12_spill] sm:$0xff] %v2448_v62  ;;  %766 = vmax.xlane.f32.xlu1 %v765_v60  ;;  %775 = vmax.xlane.f32.xlu0 %v774_v61 }
 0x12b   : > { %v2450_v63 = vpop.f32.mrf.mxu0 }
 0x12c   : > { %3041 = vst [vmem:[#allocation13_spill] sm:$0xff] %v2450_v63 }
 0x12d   : > { %v2456_v2 = vpop.f32.mrf.mxu0 }
 0x12e   : > { %760 = vmax.xlane.f32.xlu1 %v759_v0  ;;  %769 = vmax.xlane.f32.xlu0 %v768_v1 }
 0x12f   : > { %v2458_v3 = vpop.f32.mrf.mxu0 }
 0x131   : > { %v2464_v6 = vpop.f32.mrf.mxu0 }
 0x132   : > { %754 = vmax.xlane.f32.xlu1 %v753_v4  ;;  %763 = vmax.xlane.f32.xlu0 %v762_v5 }
 0x133   : > { %v2466_v7 = vpop.f32.mrf.mxu0 }
 0x135   : > { %v2472_v10 = vpop.f32.mrf.mxu0 }
 0x136   : > { %748 = vmax.xlane.f32.xlu1 %v747_v8  ;;  %757 = vmax.xlane.f32.xlu0 %v756_v9 }
 0x137   : > { %v2474_v11 = vpop.f32.mrf.mxu0 }
 0x139   : > { %v2478_v13 = vpop.f32.mrf.mxu0 }
 0x13a   : > { %751 = vmax.xlane.f32.xlu0 %v750_v12 }
 0x13b   : > { %v2480_v14 = vpop.f32.mrf.mxu0 }
 0x13d   : > { %v2484_v16 = vpop.f32.mrf.mxu0 }
 0x13e   : > { %745 = vmax.xlane.f32.xlu0 %v744_v15 }
 0x13f   : > { %v2486_v17 = vpop.f32.mrf.mxu0 }
 0x141   : > { %v2488_v18 = vpop.f32.mrf.mxu0 }
 0x143   : > { %v2490_v19 = vpop.f32.mrf.mxu0 }
 0x145   : > { %v2492_v46 = vpop.f32.mrf.mxu0 }
 0x146   : > { %3042 = vst [vmem:[#allocation14_spill] sm:$0xff] %v2492_v46 }
 0x147   : > { %v2494_v49 = vpop.f32.mrf.mxu0 }
 0x148   : > { %3043 = vst [vmem:[#allocation15_spill] sm:$0xff] %v2494_v49 }
 0x149   : > { %v2496_v52 = vpop.f32.mrf.mxu0 }
 0x14a   : > { %3044 = vst [vmem:[#allocation16_spill] sm:$0xff] %v2496_v52 }
 0x14b   : > { %v2498_v53 = vpop.f32.mrf.mxu0 }
 0x14c   : > { %3045 = vst [vmem:[#allocation17_spill] sm:$0xff] %v2498_v53 }
 0x14d   : > { %v2500_v56 = vpop.f32.mrf.mxu0 }
 0x14f   : > { %v2502_v57 = vpop.f32.mrf.mxu0 }
 0x150   : > { %3046 = vst [vmem:[#allocation18_spill] sm:$0xff] %v2502_v57  ;;  %v822_v59 = vmax.f32 %v2500_v56, %v2502_v57 }
 0x151   : > { %v2504_v60 = vpop.f32.mrf.mxu0 }
 0x153   : > { %v2506_v61 = vpop.f32.mrf.mxu0 }
 0x154   : > { %3047 = vst [vmem:[#allocation19_spill] sm:$0xff] %v2506_v61 }
 0x155   : > { %v2508_v0 = vpop.f32.mrf.mxu0 }
 0x157   : > { %v2510_v1 = vpop.f32.mrf.mxu0 }
 0x158   : > { %3048 = vst [vmem:[#allocation20_spill] sm:$0xff] %v2510_v1  ;;  %v828_v62 = vmax.f32 %v2508_v0, %v2510_v1  ;;  %v825_v1 = vmax.f32 %v2504_v60, %v2506_v61 }
 0x159   : > { %v2512_v4 = vpop.f32.mrf.mxu0 }
 0x15a   : > { %3049 = vst [vmem:[#allocation21_spill] sm:$0xff] %v2512_v4 }
 0x15b   : > { %v2514_v5 = vpop.f32.mrf.mxu0 }
 0x15c   : > { %3050 = vst [vmem:[#allocation22_spill] sm:$0xff] %v2514_v5  ;;  %v831_v23 = vmax.f32 %v2512_v4, %v2514_v5 }
 0x15d   : > { %v2516_v8 = vpop.f32.mrf.mxu0 }
 0x15f   : > { %v2518_v9 = vpop.f32.mrf.mxu0 }
 0x160   : > { %v834_v12 = vmax.f32 %v2516_v8, %v2518_v9 }
 0x161   : > { %v2522_v15 = vpop.f32.mrf.mxu0 }
 0x162   : > { %835 = vmax.xlane.f32.xlu0 %v834_v12  ;;  %v816_v12 = vmax.f32 %v2492_v46, %v2494_v49 }
 0x163   : > { %v2526_v63 = vpop.f32.mrf.mxu0 }
 0x164   : > { %3051 = vst [vmem:[#allocation23_spill] sm:$0xff] %v2526_v63  ;;  %v837_v58 = vmax.f32 %v2522_v15, %v2526_v63 }
 0x166   : > { %829 = vmax.xlane.f32.xlu0 %v828_v62  ;;  %838 = vmax.xlane.f32.xlu1 %v837_v58  ;;  %v819_v62 = vmax.f32 %v2496_v52, %v2498_v53 }
 0x16a   : > { %823 = vmax.xlane.f32.xlu0 %v822_v59  ;;  %832 = vmax.xlane.f32.xlu1 %v831_v23 }
 0x16e   : > { %817 = vmax.xlane.f32.xlu0 %v816_v12  ;;  %826 = vmax.xlane.f32.xlu1 %v825_v1 }
 0x172   : > { %820 = vmax.xlane.f32.xlu1 %v819_v62 }
 0x1a3   : > { %v782_v58 = vpop.xlane.xlu1 %781 }
 0x1a4   : > { %v864_v49 = vsub.f32 %v2412_v44, %v782_v58  ;;  %v865_v12 = vsub.f32 %v2414_v45, %v782_v58 }
 0x1a7   : > { %v785_v1 = vpop.xlane.xlu1 %784 }
 0x1ab   : > { %v788_v63 = vpop.xlane.xlu0 %787  ;;  %v779_v44 = vpop.xlane.xlu1 %778 }
 0x1ac   : > { %v868_v57 = vsub.f32 %v2424_v50, %v788_v63  ;;  %v869_v5 = vsub.f32 %v2426_v51, %v788_v63  ;;  %v952_v50 = vmul.f32 1.442695, %v864_v49  ;;  %v866_v51 = vsub.f32 %v2418_v47, %v785_v1 }
 0x1ad   : > { %v954_v63 = vmul.f32 1.442695, %v865_v12  ;;  %v862_v49 = vsub.f32 %v2408_v42, %v779_v44  ;;  %v863_v47 = vsub.f32 %v2410_v43, %v779_v44 }
 0x1ae   : > { %v960_v59 = vmul.f32 1.442695, %v868_v57  ;;  %v962_v23 = vmul.f32 1.442695, %v869_v5  ;;  %v867_v57 = vsub.f32 %v2420_v48, %v785_v1 }
 0x1af   : > { %v791_v4 = vpop.xlane.xlu0 %790  ;;  %v773_v48 = vpop.xlane.xlu1 %772 }
 0x1b0   : > { %v870_v46 = vsub.f32 %v2432_v54, %v791_v4  ;;  %v871_v61 = vsub.f32 %v2434_v55, %v791_v4  ;;  %1918 = vpow2.f32 %v960_v59  ;;  %v956_v54 = vmul.f32 1.442695, %v866_v51 }
 0x1b1   : > { %1920 = vpow2.f32 %v962_v23  ;;  %v958_v55 = vmul.f32 1.442695, %v867_v57 }
 0x1b2   : > { %v964_v62 = vmul.f32 1.442695, %v870_v46  ;;  %v966_v53 = vmul.f32 1.442695, %v871_v61 }
 0x1b3   : > { %v776_v52 = vpop.xlane.xlu0 %775  ;;  %v767_v43 = vpop.xlane.xlu1 %766 }
 0x1b4   : > { %1922 = vpow2.f32 %v964_v62  ;;  %v860_v45 = vsub.f32 %v2404_v40, %v776_v52  ;;  %v861_v46 = vsub.f32 %v2406_v41, %v776_v52  ;;  %v948_v40 = vmul.f32 1.442695, %v862_v49 }
 0x1b5   : > { %1924 = vpow2.f32 %v966_v53  ;;  %v950_v41 = vmul.f32 1.442695, %v863_v47  ;;  %v858_v62 = vsub.f32 %v2400_v38, %v773_v48 }
 0x1b6   : > { %1926 = vpow2.f32 %v952_v50  ;;  %v944_v61 = vmul.f32 1.442695, %v860_v45  ;;  %v946_v5 = vmul.f32 1.442695, %v861_v46 }
 0x1b7   : > { %1928 = vpow2.f32 %v954_v63  ;;  %v770_v4 = vpop.xlane.xlu0 %769  ;;  %v940_v45 = vmul.f32 1.442695, %v858_v62 }
 0x1b8   : > { %1930 = vpow2.f32 %v956_v54  ;;  %v856_v23 = vsub.f32 %v2396_v36, %v770_v4  ;;  %v857_v52 = vsub.f32 %v2398_v37, %v770_v4  ;;  %v810_v36 = vmax.f32 %v2484_v16, %v2486_v17 }
 0x1b9   : > { %1932 = vpow2.f32 %v958_v55  ;;  %v859_v37 = vsub.f32 %v2402_v39, %v773_v48  ;;  %v813_v55 = vmax.f32 %v2488_v18, %v2490_v19  ;;  %v761_v39 = vpop.xlane.xlu1 %760  ;;  %v854_v48 = vsub.f32 %v2392_v34, %v767_v43 }
 0x1ba   : > { %1934 = vpow2.f32 %v944_v61  ;;  %v936_v50 = vmul.f32 1.442695, %v856_v23  ;;  %v938_v63 = vmul.f32 1.442695, %v857_v52 }
 0x1bb   : > { %v764_v53 = vpop.xlane.xlu0 %763  ;;  %1936 = vpow2.f32 %v946_v5  ;;  %v942_v4 = vmul.f32 1.442695, %v859_v37  ;;  %v855_v5 = vsub.f32 %v2394_v35, %v767_v43  ;;  %v850_v43 = vsub.f32 %v2384_v30, %v761_v39 }
 0x1bc   : > { %1938 = vpow2.f32 %v948_v40  ;;  %v852_v38 = vsub.f32 %v2388_v32, %v764_v53  ;;  %v853_v49 = vsub.f32 %v2390_v33, %v764_v53 }
 0x1bd   : > { %v2552_v58 = vpop.eup %1918  ;;  %1940 = vpow2.f32 %v950_v41  ;;  %v804_v41 = vmax.f32 %v2472_v10, %v2474_v11  ;;  %v934_v62 = vmul.f32 1.442695, %v855_v5 }
 0x1be   : > { %v2554_v59 = vpop.eup %1920  ;;  %1942 = vpow2.f32 %v936_v50  ;;  %v928_v40 = vmul.f32 1.442695, %v852_v38  ;;  %v930_v53 = vmul.f32 1.442695, %v853_v49  ;;  %v755_v50 = vpop.xlane.xlu1 %754  ;;  %v924_v38 = vmul.f32 1.442695, %v850_v43 }
 0x1bf   : > { %v1074_v42 = vadd.f32 %v2554_v59, %v2552_v58  ;;  %v758_v57 = vpop.xlane.xlu0 %757  ;;  %1944 = vpow2.f32 %v938_v63  ;;  %v798_v49 = vmax.f32 %v2456_v2, %v2458_v3 }
 0x1c0   : > { %1946 = vpow2.f32 %v940_v45  ;;  %v848_v23 = vsub.f32 %v2380_v28, %v758_v57  ;;  %v849_v52 = vsub.f32 %v2382_v29, %v758_v57  ;;  %v851_v28 = vsub.f32 %v2386_v31, %v761_v39 }
 0x1c1   : > { %v2560_v12 = vpop.eup %1922  ;;  %1075 = vadd.xlane.f32.xlu0 %v1074_v42  ;;  %1948 = vpow2.f32 %v942_v4  ;;  %v932_v42 = vmul.f32 1.442695, %v854_v48  ;;  %v807_v29 = vmax.f32 %v2478_v13, %v2480_v14  ;;  %v847_v4 = vsub.f32 %v2378_v27, %v755_v50 }
 0x1c2   : > { %v2562_v1 = vpop.eup %1924  ;;  %1950 = vpow2.f32 %v928_v40  ;;  %v922_v57 = vmul.f32 1.442695, %v849_v52  ;;  %v749_v48 = vpop.xlane.xlu1 %748 }
 0x1c3   : > { %v2567_v51 = vpop.eup %1926  ;;  %v1077_v44 = vadd.f32 %v2562_v1, %v2560_v12  ;;  %v752_v32 = vpop.xlane.xlu0 %751  ;;  %1952 = vpow2.f32 %v930_v53  ;;  %v801_v53 = vmax.f32 %v2464_v6, %v2466_v7 }
 0x1c4   : > { %v2572_v54 = vpop.eup %1928  ;;  %v844_v37 = vsub.f32 %v2372_v24, %v752_v32  ;;  %1954 = vpow2.f32 %v932_v42  ;;  %v926_v24 = vmul.f32 1.442695, %v851_v28 }
 0x1c5   : > { %811 = vmax.xlane.f32.xlu0 %v810_v36  ;;  %1078 = vadd.xlane.f32.xlu1 %v1077_v44  ;;  %v2577_v46 = vpop.eup %1930  ;;  %v1068_v61 = vadd.f32 %v2572_v54, %v2567_v51  ;;  %v920_v36 = vmul.f32 1.442695, %v848_v23  ;;  %v845_v44 = vsub.f32 %v2374_v25, %v752_v32  ;;  %1956 = vpow2.f32 %v934_v62 }
 0x1c6   : > { %v2582_v47 = vpop.eup %1932  ;;  %v912_v39 = vmul.f32 1.442695, %v844_v37  ;;  %v918_v23 = vmul.f32 1.442695, %v847_v4  ;;  %v3054_v37 = vld [vmem:[#allocation10_spill] sm:$0xff]  ;;  %v3056_v4 = vld [vmem:[#allocation12_spill] sm:$0xff] }
 0x1c7   : > { %v2589_v33 = vpop.eup %1934  ;;  %v1071_v34 = vadd.f32 %v2582_v47, %v2577_v46  ;;  %v746_v30 = vpop.xlane.xlu0 %745  ;;  %1958 = vpow2.f32 %v920_v36  ;;  %v914_v5 = vmul.f32 1.442695, %v845_v44  ;;  %v3053_v36 = vld [vmem:[#allocation11_spill] sm:$0xff] }
 0x1c8   : > { %v2594_v35 = vpop.eup %1936  ;;  %v840_v25 = vsub.f32 %v2364_v20, %v746_v30  ;;  %1960 = vpow2.f32 %v922_v57  ;;  %v842_v20 = vsub.f32 %v2368_v22, %v749_v48 }
 0x1c9   : > { %1069 = vadd.xlane.f32.xlu0 %v1068_v61  ;;  %814 = vmax.xlane.f32.xlu1 %v813_v55  ;;  %v2601_v63 = vpop.eup %1938  ;;  %v1062_v31 = vadd.f32 %v2594_v35, %v2589_v33  ;;  %v846_v55 = vsub.f32 %v2376_v26, %v755_v50  ;;  %v841_v26 = vsub.f32 %v2366_v21, %v746_v30  ;;  %1962 = vpow2.f32 %v924_v38  ;;  %v3052_v21 = vld [vmem:[#allocation9_spill] sm:$0xff] }
 0x1ca   : > { %v2606_v45 = vpop.eup %1940  ;;  %1964 = vpow2.f32 %v926_v24  ;;  %v908_v22 = vmul.f32 1.442695, %v842_v20  ;;  %v3055_v24 = vld [vmem:[#allocation13_spill] sm:$0xff] }
 0x1cb   : > { %v2613_v61 = vpop.eup %1942  ;;  %v1065_v32 = vadd.f32 %v2606_v45, %v2601_v63  ;;  %v916_v40 = vmul.f32 1.442695, %v846_v55  ;;  %1966 = vpow2.f32 %v912_v39  ;;  %v906_v42 = vmul.f32 1.442695, %v841_v26 }
 0x1cc   : > { %v2618_v27 = vpop.eup %1944  ;;  %1968 = vpow2.f32 %v914_v5  ;;  %v795_v39 = vmax.f32 %v3056_v4, %v3055_v24 }
 0x1cd   : > { %805 = vmax.xlane.f32.xlu0 %v804_v41  ;;  %1072 = vadd.xlane.f32.xlu1 %v1071_v34  ;;  %v904_v41 = vmul.f32 1.442695, %v840_v25  ;;  %v2623_v52 = vpop.eup %1946  ;;  %v843_v34 = vsub.f32 %v3052_v21, %v749_v48  ;;  %v1056_v43 = vadd.f32 %v2618_v27, %v2613_v61  ;;  %1970 = vpow2.f32 %v916_v40 }
 0x1ce   : > { %v2628_v62 = vpop.eup %1948  ;;  %1972 = vpow2.f32 %v918_v23 }
 0x1cf   : > { %1974 = vpow2.f32 %v904_v41  ;;  %v2630_v28 = vpop.eup %1950  ;;  %v910_v50 = vmul.f32 1.442695, %v843_v34  ;;  %v1059_v57 = vadd.f32 %v2628_v62, %v2623_v52 }
 0x1d0   : > { %1976 = vpow2.f32 %v906_v42  ;;  %v2636_v44 = vpop.eup %1952 }
 0x1d1   : > { %1063 = vadd.xlane.f32.xlu0 %v1062_v31  ;;  %808 = vmax.xlane.f32.xlu1 %v807_v29  ;;  %v792_v29 = vmax.f32 %v3054_v37, %v3053_v36  ;;  %v2638_v30 = vpop.eup %1954  ;;  %1978 = vpow2.f32 %v908_v22  ;;  %v1050_v55 = vadd.f32 %v2636_v44, %v2630_v28 }
 0x1d2   : > { %v2640_v31 = vpop.eup %1956  ;;  %1980 = vpow2.f32 %v910_v50 }
 0x1d4   : > { %v2642_v38 = vpop.eup %1958 }
 0x1d5   : > { %799 = vmax.xlane.f32.xlu0 %v798_v49  ;;  %1066 = vadd.xlane.f32.xlu1 %v1065_v32  ;;  %v2648_v25 = vpop.eup %1960  ;;  %v1053_v32 = vadd.f32 %v2640_v31, %v2638_v30 }
 0x1d6   : > { %v2650_v49 = vpop.eup %1962  ;;  %v1044_v26 = vadd.f32 %v2648_v25, %v2642_v38 }
 0x1d7   : > { %3057 = vst [vmem:[#allocation9_spill] sm:$0xff] %v2650_v49  ;;  %v2652_v48 = vpop.eup %1964 }
 0x1d8   : > { %v2654_v5 = vpop.eup %1966  ;;  %v1047_v21 = vadd.f32 %v2652_v48, %v2650_v49 }
 0x1d9   : > { %1057 = vadd.xlane.f32.xlu0 %v1056_v43  ;;  %802 = vmax.xlane.f32.xlu1 %v801_v53  ;;  %v2660_v40 = vpop.eup %1968 }
 0x1da   : > { %v2662_v23 = vpop.eup %1970  ;;  %v1038_v53 = vadd.f32 %v2660_v40, %v2654_v5 }
 0x1db   : > { %3058 = vst [vmem:[#allocation11_spill] sm:$0xff] %v2662_v23  ;;  %v2664_v20 = vpop.eup %1972 }
 0x1dc   : > { %3059 = vst [vmem:[#allocation10_spill] sm:$0xff] %v2664_v20  ;;  %v2666_v41 = vpop.eup %1974 }
 0x1dd   : > { %793 = vmax.xlane.f32.xlu0 %v792_v29  ;;  %1060 = vadd.xlane.f32.xlu1 %v1059_v57  ;;  %3060 = vst [vmem:[#allocation13_spill] sm:$0xff] %v2666_v41  ;;  %v2672_v34 = vpop.eup %1976  ;;  %v1041_v57 = vadd.f32 %v2664_v20, %v2662_v23 }
 0x1de   : > { %3061 = vst [vmem:[#allocation12_spill] sm:$0xff] %v2672_v34  ;;  %v2676_v50 = vpop.eup %1978  ;;  %v1032_v29 = vadd.f32 %v2672_v34, %v2666_v41  ;;  %v3065_v41 = vld [vmem:[#allocation23_spill] sm:$0xff] }
 0x1df   : > { %3062 = vst [vmem:[#allocation24_spill] sm:$0xff] %v2676_v50 }
 0x1e1   : > { %1051 = vadd.xlane.f32.xlu0 %v1050_v55  ;;  %796 = vmax.xlane.f32.xlu1 %v795_v39  ;;  %v2682_v55 = vpop.eup %1980 }
 0x1e2   : > { %3063 = vst [vmem:[#allocation25_spill] sm:$0xff] %v2682_v55  ;;  %v1035_v23 = vadd.f32 %v2682_v55, %v2676_v50  ;;  %v3070_v55 = vld [vmem:[#allocation15_spill] sm:$0xff] }
 0x1e5   : > { %1045 = vadd.xlane.f32.xlu0 %v1044_v26  ;;  %1054 = vadd.xlane.f32.xlu1 %v1053_v32 }
 0x1e9   : > { %1039 = vadd.xlane.f32.xlu0 %v1038_v53  ;;  %1048 = vadd.xlane.f32.xlu1 %v1047_v21 }
 0x1eb   : > { %v836_v42 = vpop.xlane.xlu0 %835 }
 0x1ec   : > { %v900_v43 = vsub.f32 %v2516_v8, %v836_v42  ;;  %v901_v22 = vsub.f32 %v2518_v9, %v836_v42  ;;  %v3064_v9 = vld [vmem:[#allocation20_spill] sm:$0xff] }
 0x1ed   : > { %1033 = vadd.xlane.f32.xlu0 %v1032_v29  ;;  %1042 = vadd.xlane.f32.xlu1 %v1041_v57 }
 0x1ee   : > { %v1024_v39 = vmul.f32 1.442695, %v900_v43  ;;  %v1026_v26 = vmul.f32 1.442695, %v901_v22 }
 0x1ef   : > { %v830_v32 = vpop.xlane.xlu0 %829  ;;  %v839_v53 = vpop.xlane.xlu1 %838 }
 0x1f0   : > { %1982 = vpow2.f32 %v1024_v39  ;;  %v896_v8 = vsub.f32 %v2508_v0, %v830_v32  ;;  %v897_v21 = vsub.f32 %v3064_v9, %v830_v32  ;;  %v902_v42 = vsub.f32 %v2522_v15, %v839_v53  ;;  %v3066_v39 = vld [vmem:[#allocation18_spill] sm:$0xff]  ;;  %v3067_v9 = vld [vmem:[#allocation21_spill] sm:$0xff] }
 0x1f1   : > { %1984 = vpow2.f32 %v1026_v26  ;;  %v903_v34 = vsub.f32 %v3065_v41, %v839_v53  ;;  %1036 = vadd.xlane.f32.xlu1 %v1035_v23  ;;  %v3068_v26 = vld [vmem:[#allocation22_spill] sm:$0xff] }
 0x1f2   : > { %v1016_v20 = vmul.f32 1.442695, %v896_v8  ;;  %v1018_v43 = vmul.f32 1.442695, %v897_v21  ;;  %v1028_v22 = vmul.f32 1.442695, %v902_v42 }
 0x1f3   : > { %v1030_v29 = vmul.f32 1.442695, %v903_v34  ;;  %v824_v57 = vpop.xlane.xlu0 %823  ;;  %v833_v49 = vpop.xlane.xlu1 %832  ;;  %v3069_v42 = vld [vmem:[#allocation14_spill] sm:$0xff] }
 0x1f4   : > { %1986 = vpow2.f32 %v1016_v20  ;;  %v892_v0 = vsub.f32 %v2500_v56, %v824_v57  ;;  %v893_v32 = vsub.f32 %v3066_v39, %v824_v57  ;;  %v898_v15 = vsub.f32 %v3067_v9, %v833_v49  ;;  %v3071_v39 = vld [vmem:[#allocation19_spill] sm:$0xff]  ;;  %v3072_v9 = vld [vmem:[#allocation16_spill] sm:$0xff] }
 0x1f5   : > { %1988 = vpow2.f32 %v1018_v43  ;;  %v899_v41 = vsub.f32 %v3068_v26, %v833_v49  ;;  %v3073_v26 = vld [vmem:[#allocation17_spill] sm:$0xff] }
 0x1f6   : > { %1990 = vpow2.f32 %v1028_v22  ;;  %v1008_v53 = vmul.f32 1.442695, %v892_v0  ;;  %v1010_v50 = vmul.f32 1.442695, %v893_v32  ;;  %v1020_v8 = vmul.f32 1.442695, %v898_v15 }
 0x1f7   : > { %1992 = vpow2.f32 %v1030_v29  ;;  %v1022_v21 = vmul.f32 1.442695, %v899_v41  ;;  %v818_v34 = vpop.xlane.xlu0 %817  ;;  %v827_v23 = vpop.xlane.xlu1 %826 }
 0x1f8   : > { %1994 = vpow2.f32 %v1008_v53  ;;  %v888_v20 = vsub.f32 %v3069_v42, %v818_v34  ;;  %v889_v56 = vsub.f32 %v3070_v55, %v818_v34  ;;  %v894_v57 = vsub.f32 %v2504_v60, %v827_v23 }
 0x1f9   : > { %1996 = vpow2.f32 %v1010_v50  ;;  %v895_v43 = vsub.f32 %v3071_v39, %v827_v23 }
 0x1fa   : > { %1998 = vpow2.f32 %v1020_v8  ;;  %v1000_v49 = vmul.f32 1.442695, %v888_v20  ;;  %v1002_v22 = vmul.f32 1.442695, %v889_v56  ;;  %v1012_v0 = vmul.f32 1.442695, %v894_v57 }
 0x1fb   : > { %2000 = vpow2.f32 %v1022_v21  ;;  %v1014_v32 = vmul.f32 1.442695, %v895_v43  ;;  %v821_v29 = vpop.xlane.xlu1 %820 }
 0x1fc   : > { %2002 = vpow2.f32 %v1000_v49  ;;  %v890_v15 = vsub.f32 %v3072_v9, %v821_v29  ;;  %v891_v41 = vsub.f32 %v3073_v26, %v821_v29 }
 0x1fd   : > { %v2700_v53 = vpop.eup %1982  ;;  %2004 = vpow2.f32 %v1002_v22 }
 0x1fe   : > { %v2702_v55 = vpop.eup %1984  ;;  %2006 = vpow2.f32 %v1012_v0  ;;  %v1004_v60 = vmul.f32 1.442695, %v890_v15  ;;  %v1006_v50 = vmul.f32 1.442695, %v891_v41 }
 0x1ff   : > { %2008 = vpow2.f32 %v1014_v32  ;;  %v1122_v8 = vadd.f32 %v2702_v55, %v2700_v53 }
 0x200   : > { %2010 = vpow2.f32 %v1004_v60 }
 0x201   : > { %v2706_v21 = vpop.eup %1986  ;;  %2012 = vpow2.f32 %v1006_v50  ;;  %1123 = vadd.xlane.f32.xlu0 %v1122_v8 }
 0x202   : > { %v2708_v34 = vpop.eup %1988 }
 0x203   : > { %v2710_v23 = vpop.eup %1990  ;;  %v1116_v42 = vadd.f32 %v2708_v34, %v2706_v21 }
 0x204   : > { %v2714_v20 = vpop.eup %1992 }
 0x205   : > { %v2716_v56 = vpop.eup %1994  ;;  %1117 = vadd.xlane.f32.xlu0 %v1116_v42  ;;  %v1125_v57 = vadd.f32 %v2714_v20, %v2710_v23 }
 0x206   : > { %v2720_v39 = vpop.eup %1996 }
 0x207   : > { %v2722_v43 = vpop.eup %1998  ;;  %1126 = vadd.xlane.f32.xlu1 %v1125_v57  ;;  %v1110_v49 = vadd.f32 %v2720_v39, %v2716_v56 }
 0x208   : > { %v2726_v22 = vpop.eup %2000 }
 0x209   : > { %v2728_v0 = vpop.eup %2002  ;;  %1111 = vadd.xlane.f32.xlu0 %v1110_v49  ;;  %v1119_v32 = vadd.f32 %v2726_v22, %v2722_v43 }
 0x20a   : > { %3074 = vst [vmem:[#allocation20_spill] sm:$0xff] %v2728_v0  ;;  %v2732_v29 = vpop.eup %2004 }
 0x20b   : > { %3075 = vst [vmem:[#allocation23_spill] sm:$0xff] %v2732_v29  ;;  %v2734_v9 = vpop.eup %2006  ;;  %1120 = vadd.xlane.f32.xlu1 %v1119_v32  ;;  %v1104_v15 = vadd.f32 %v2732_v29, %v2728_v0 }
 0x20c   : > { %3076 = vst [vmem:[#allocation18_spill] sm:$0xff] %v2734_v9  ;;  %v2738_v26 = vpop.eup %2008 }
 0x20d   : > { %3077 = vst [vmem:[#allocation21_spill] sm:$0xff] %v2738_v26  ;;  %v2740_v41 = vpop.eup %2010  ;;  %1105 = vadd.xlane.f32.xlu0 %v1104_v15  ;;  %v1113_v60 = vadd.f32 %v2738_v26, %v2734_v9 }
 0x20e   : > { %3078 = vst [vmem:[#allocation22_spill] sm:$0xff] %v2740_v41  ;;  %v2744_v50 = vpop.eup %2012 }
 0x20f   : > { %3079 = vst [vmem:[#allocation14_spill] sm:$0xff] %v2744_v50  ;;  %1114 = vadd.xlane.f32.xlu1 %v1113_v60  ;;  %v1107_v8 = vadd.f32 %v2744_v50, %v2740_v41 }
 0x213   : > { %1108 = vadd.xlane.f32.xlu1 %v1107_v8 }
 0x24a   : > { %v1076_v42 = vpop.xlane.xlu0 %1075 }
 0x24b   : > { %2014 = vrcp.f32 %v1076_v42 }
 0x24e   : > { %v812_v57 = vpop.xlane.xlu0 %811  ;;  %v1079_v49 = vpop.xlane.xlu1 %1078 }
 0x24f   : > { %v884_v32 = vsub.f32 %v2484_v16, %v812_v57  ;;  %v885_v0 = vsub.f32 %v2486_v17, %v812_v57  ;;  %2016 = vrcp.f32 %v1079_v49 }
 0x251   : > { %v992_v15 = vmul.f32 1.442695, %v884_v32  ;;  %v994_v29 = vmul.f32 1.442695, %v885_v0 }
 0x252   : > { %v1070_v9 = vpop.xlane.xlu0 %1069  ;;  %v815_v26 = vpop.xlane.xlu1 %814 }
 0x253   : > { %2018 = vpow2.f32 %v992_v15  ;;  %v886_v60 = vsub.f32 %v2488_v18, %v815_v26  ;;  %v887_v41 = vsub.f32 %v2490_v19, %v815_v26 }
 0x254   : > { %2020 = vpow2.f32 %v994_v29 }
 0x255   : > { %2022 = vrcp.f32 %v1070_v9  ;;  %v996_v8 = vmul.f32 1.442695, %v886_v60  ;;  %v998_v42 = vmul.f32 1.442695, %v887_v41 }
 0x256   : > { %v806_v16 = vpop.xlane.xlu0 %805  ;;  %v1073_v50 = vpop.xlane.xlu1 %1072 }
 0x257   : > { %2024 = vpow2.f32 %v996_v8  ;;  %v880_v17 = vsub.f32 %v2472_v10, %v806_v16  ;;  %v881_v0 = vsub.f32 %v2474_v11, %v806_v16 }
 0x258   : > { %v2015_v57 = vpop.eup %2014  ;;  %2026 = vpow2.f32 %v998_v42 }
 0x259   : > { %v984_v18 = vmul.f32 1.442695, %v880_v17  ;;  %v986_v49 = vmul.f32 1.442695, %v881_v0  ;;  %2028 = vrcp.f32 %v1073_v50  ;;  %v1189_v19 = vmul.f32 %v2015_v57, %v2554_v59 }
 0x25a   : > { %v1064_v29 = vpop.xlane.xlu0 %1063  ;;  %v809_v9 = vpop.xlane.xlu1 %808  ;;  %v1188_v26 = vmul.f32 %v2015_v57, %v2552_v58 }
 0x25b   : > { %2030 = vpow2.f32 %v984_v18  ;;  %v882_v41 = vsub.f32 %v2478_v13, %v809_v9  ;;  %v883_v32 = vsub.f32 %v2480_v14, %v809_v9 }
 0x25c   : > { %v2017_v10 = vpop.eup %2016  ;;  %2032 = vpow2.f32 %v986_v49  ;;  %v1818_v11 = vpack.c.bf16 %v1189_v19, %v1188_v26 }
 0x25d   : > { %2034 = vrcp.f32 %v1064_v29  ;;  %v988_v15 = vmul.f32 1.442695, %v882_v41  ;;  %v990_v60 = vmul.f32 1.442695, %v883_v32  ;;  %v1191_v8 = vmul.f32 %v2017_v10, %v2562_v1 }
 0x25e   : > { %v800_v50 = vpop.xlane.xlu0 %799  ;;  %v1067_v42 = vpop.xlane.xlu1 %1066  ;;  %v1190_v59 = vmul.f32 %v2017_v10, %v2560_v12  ;;  %1430 = vst [vmem:[%s2764_s4 + $0x70] sm:$0xff] %v1818_v11 }
 0x25f   : > { %2036 = vpow2.f32 %v988_v15  ;;  %v876_v13 = vsub.f32 %v2456_v2, %v800_v50  ;;  %v877_v14 = vsub.f32 %v2458_v3, %v800_v50  ;;  %v1239_v58 = vpack.c.bf16 %v1191_v8, %v1189_v19 }
 0x260   : > { %v2769_v16 = vpop.eup %2018  ;;  %2038 = vpow2.f32 %v990_v60  ;;  %v1238_v17 = vpack.c.bf16 %v1190_v59, %v1188_v26  ;;  %v1819_v1 = vpack.c.bf16 %v1191_v8, %v1190_v59 }
 0x261   : > { %v2771_v0 = vpop.eup %2020  ;;  %v976_v57 = vmul.f32 1.442695, %v876_v13  ;;  %v978_v12 = vmul.f32 1.442695, %v877_v14  ;;  %2040 = vrcp.f32 %v1067_v42  ;;  %1460 = vmatprep.subr.bf16.mxu1 %v1239_v58 }
 0x262   : > { %v2023_v18 = vpop.eup %2022  ;;  %v1058_v49 = vpop.xlane.xlu0 %1057  ;;  %1431 = vst [vmem:[%s2764_s4 + $0x78] sm:$0xff] %v1819_v1  ;;  %1461 = vmatpush1.bf16.xpose.msra.mxu1 %v1238_v17  ;;  %v1098_v2 = vadd.f32 %v2771_v0, %v2769_v16 }
 0x263   : > { %v803_v29 = vpop.xlane.xlu1 %802  ;;  %2042 = vpow2.f32 %v976_v57  ;;  %v1185_v9 = vmul.f32 %v2023_v18, %v2572_v54  ;;  %v1184_v41 = vmul.f32 %v2023_v18, %v2567_v51 }
 0x264   : > { %v878_v3 = vsub.f32 %v2464_v6, %v803_v29  ;;  %v879_v19 = vsub.f32 %v2466_v7, %v803_v29  ;;  %v2779_v26 = vpop.eup %2024  ;;  %2044 = vpow2.f32 %v978_v12  ;;  %1099 = vadd.xlane.f32.xlu0 %v1098_v2 }
 0x265   : > { %v2782_v32 = vpop.eup %2026  ;;  %2046 = vrcp.f32 %v1058_v49  ;;  %v1816_v7 = vpack.c.bf16 %v1185_v9, %v1184_v41 }
 0x266   : > { %v980_v10 = vmul.f32 1.442695, %v878_v3  ;;  %v982_v11 = vmul.f32 1.442695, %v879_v19  ;;  %v2029_v15 = vpop.eup %2028  ;;  %v794_v60 = vpop.xlane.xlu0 %793  ;;  %v1101_v6 = vadd.f32 %v2782_v32, %v2779_v26 }
 0x267   : > { %v1061_v8 = vpop.xlane.xlu1 %1060  ;;  %v872_v54 = vsub.f32 %v3054_v37, %v794_v60  ;;  %v873_v50 = vsub.f32 %v3053_v36, %v794_v60  ;;  %v1187_v51 = vmul.f32 %v2029_v15, %v2582_v47  ;;  %v1186_v59 = vmul.f32 %v2029_v15, %v2577_v46  ;;  %1428 = vst [vmem:[%s2764_s4 + $0x60] sm:$0xff] %v1816_v7 }
 0x268   : > { %2048 = vpow2.f32 %v980_v10  ;;  %v2789_v42 = vpop.eup %2030  ;;  %1102 = vadd.xlane.f32.xlu1 %v1101_v6 }
 0x269   : > { %2050 = vpow2.f32 %v982_v11  ;;  %v2793_v13 = vpop.eup %2032  ;;  %v968_v14 = vmul.f32 1.442695, %v872_v54  ;;  %v970_v58 = vmul.f32 1.442695, %v873_v50  ;;  %v1237_v17 = vpack.c.bf16 %v1187_v51, %v1185_v9 }
 0x26a   : > { %2052 = vrcp.f32 %v1061_v8  ;;  %v2035_v1 = vpop.eup %2034  ;;  %v1052_v37 = vpop.xlane.xlu0 %1051  ;;  %v1236_v57 = vpack.c.bf16 %v1186_v59, %v1184_v41  ;;  %v1817_v36 = vpack.c.bf16 %v1187_v51, %v1186_v59  ;;  %v1092_v47 = vadd.f32 %v2793_v13, %v2789_v42 }
 0x26b   : > { %v797_v12 = vpop.xlane.xlu1 %796  ;;  %2054 = vpow2.f32 %v968_v14  ;;  %1462 = vmatprep.subr.bf16.mxu1 %v1237_v17  ;;  %v1181_v49 = vmul.f32 %v2035_v1, %v2594_v35  ;;  %v1180_v2 = vmul.f32 %v2035_v1, %v2589_v33 }
 0x26c   : > { %v874_v46 = vsub.f32 %v3056_v4, %v797_v12  ;;  %v875_v18 = vsub.f32 %v3055_v24, %v797_v12  ;;  %v2800_v29 = vpop.eup %2036  ;;  %2056 = vpow2.f32 %v970_v58  ;;  %1429 = vst [vmem:[%s2764_s4 + $0x68] sm:$0xff] %v1817_v36  ;;  %1463 = vmatpush1.bf16.xpose.msra.mxu1 %v1236_v57  ;;  %1093 = vadd.xlane.f32.xlu0 %v1092_v47 }
 0x26d   : > { %v2804_v3 = vpop.eup %2038  ;;  %2058 = vrcp.f32 %v1052_v37  ;;  %v1814_v24 = vpack.c.bf16 %v1181_v49, %v1180_v2 }
 0x26e   : > { %v972_v19 = vmul.f32 1.442695, %v874_v46  ;;  %v974_v9 = vmul.f32 1.442695, %v875_v18  ;;  %v2041_v41 = vpop.eup %2040  ;;  %v1046_v4 = vpop.xlane.xlu0 %1045  ;;  %v1095_v35 = vadd.f32 %v2804_v3, %v2800_v29 }
 0x26f   : > { %v1055_v10 = vpop.xlane.xlu1 %1054  ;;  %v1183_v11 = vmul.f32 %v2041_v41, %v2606_v45  ;;  %v1182_v15 = vmul.f32 %v2041_v41, %v2601_v63  ;;  %1426 = vst [vmem:[%s2764_s4 + $0x50] sm:$0xff] %v1814_v24 }
 0x270   : > { %2060 = vpow2.f32 %v972_v19  ;;  %v2810_v60 = vpop.eup %2042  ;;  %1096 = vadd.xlane.f32.xlu1 %v1095_v35 }
 0x271   : > { %2062 = vpow2.f32 %v974_v9  ;;  %v2813_v33 = vpop.eup %2044  ;;  %v1235_v8 = vpack.c.bf16 %v1183_v11, %v1181_v49  ;;  %v1234_v6 = vpack.c.bf16 %v1182_v15, %v1180_v2  ;;  %v1815_v7 = vpack.c.bf16 %v1183_v11, %v1182_v15 }
 0x272   : > { %2064 = vrcp.f32 %v1046_v4  ;;  %v2047_v54 = vpop.eup %2046  ;;  %v1040_v50 = vpop.xlane.xlu0 %1039  ;;  %v1086_v45 = vadd.f32 %v2813_v33, %v2810_v60 }
 0x273   : > { %2066 = vrcp.f32 %v1055_v10  ;;  %v1049_v51 = vpop.xlane.xlu1 %1048  ;;  %1464 = vmatprep.subr.bf16.mxu1 %v1235_v8  ;;  %1427 = vst [vmem:[%s2764_s4 + $0x58] sm:$0xff] %v1815_v7  ;;  %v1177_v63 = vmul.f32 %v2047_v54, %v2618_v27  ;;  %v1176_v59 = vmul.f32 %v2047_v54, %v2613_v61 }
 0x274   : > { %2068 = vrcp.f32 %v1040_v50  ;;  %1465 = vmatpush1.bf16.xpose.msra.mxu1 %v1234_v6  ;;  %1087 = vadd.xlane.f32.xlu0 %v1086_v45 }
 0x275   : > { %v2820_v14 = vpop.eup %2048  ;;  %2070 = vrcp.f32 %v1049_v51  ;;  %v1812_v17 = vpack.c.bf16 %v1177_v63, %v1176_v59 }
 0x276   : > { %v2822_v58 = vpop.eup %2050  ;;  %v1034_v37 = vpop.xlane.xlu0 %1033 }
 0x277   : > { %v2053_v1 = vpop.eup %2052  ;;  %v1043_v57 = vpop.xlane.xlu1 %1042  ;;  %v1089_v36 = vadd.f32 %v2822_v58, %v2820_v14  ;;  %2072 = vrcp.f32 %v1034_v37  ;;  %1424 = vst [vmem:[%s2764_s4 + $0x40] sm:$0xff] %v1812_v17 }
 0x278   : > { %v1179_v27 = vmul.f32 %v2053_v1, %v2628_v62  ;;  %v1178_v61 = vmul.f32 %v2053_v1, %v2623_v52  ;;  %v2829_v12 = vpop.eup %2054  ;;  %2074 = vrcp.f32 %v1043_v57 }
 0x279   : > { %1090 = vadd.xlane.f32.xlu1 %v1089_v36  ;;  %v2831_v47 = vpop.eup %2056  ;;  %v3082_v36 = vld [vmem:[#allocation13_spill] sm:$0xff] }
 0x27a   : > { %v1233_v46 = vpack.c.bf16 %v1179_v27, %v1177_v63  ;;  %v1232_v18 = vpack.c.bf16 %v1178_v61, %v1176_v59  ;;  %v1813_v49 = vpack.c.bf16 %v1179_v27, %v1178_v61  ;;  %v2059_v2 = vpop.eup %2058  ;;  %v1080_v9 = vadd.f32 %v2831_v47, %v2829_v12 }
 0x27b   : > { %v1037_v19 = vpop.xlane.xlu1 %1036  ;;  %v1173_v52 = vmul.f32 %v2059_v2, %v2636_v44  ;;  %v1172_v62 = vmul.f32 %v2059_v2, %v2630_v28 }
 0x27c   : > { %1466 = vmatprep.subr.bf16.mxu1 %v1233_v46  ;;  %1425 = vst [vmem:[%s2764_s4 + $0x48] sm:$0xff] %v1813_v49  ;;  %2076 = vrcp.f32 %v1037_v19  ;;  %1081 = vadd.xlane.f32.xlu0 %v1080_v9  ;;  %v3084_v46 = vld [vmem:[#allocation11_spill] sm:$0xff] }
 0x27d   : > { %v2838_v41 = vpop.eup %2060  ;;  %1467 = vmatpush1.bf16.xpose.msra.mxu1 %v1232_v18  ;;  %v1810_v10 = vpack.c.bf16 %v1173_v52, %v1172_v62 }
 0x27e   : > { %v2840_v4 = vpop.eup %2062 }
 0x27f   : > { %v2065_v35 = vpop.eup %2064  ;;  %v1083_v24 = vadd.f32 %v2840_v4, %v2838_v41  ;;  %1422 = vst [vmem:[%s2764_s4 + $0x30] sm:$0xff] %v1810_v10  ;;  %v3086_v10 = vld [vmem:[#allocation24_spill] sm:$0xff] }
 0x280   : > { %v2067_v11 = vpop.eup %2066  ;;  %v1169_v15 = vmul.f32 %v2065_v35, %v2648_v25  ;;  %v1168_v44 = vmul.f32 %v2065_v35, %v2642_v38  ;;  %v3080_v38 = vld [vmem:[#allocation9_spill] sm:$0xff] }
 0x281   : > { %v2069_v8 = vpop.eup %2068  ;;  %1084 = vadd.xlane.f32.xlu1 %v1083_v24  ;;  %v1175_v28 = vmul.f32 %v2067_v11, %v2640_v31  ;;  %v1174_v6 = vmul.f32 %v2067_v11, %v2638_v30 }
 0x282   : > { %v2071_v7 = vpop.eup %2070  ;;  %v1808_v54 = vpack.c.bf16 %v1169_v15, %v1168_v44  ;;  %v1165_v50 = vmul.f32 %v2069_v8, %v2660_v40  ;;  %v1164_v51 = vmul.f32 %v2069_v8, %v2654_v5  ;;  %v3081_v5 = vld [vmem:[#allocation12_spill] sm:$0xff] }
 0x283   : > { %v1231_v45 = vpack.c.bf16 %v1175_v28, %v1173_v52  ;;  %v1230_v63 = vpack.c.bf16 %v1174_v6, %v1172_v62  ;;  %v1811_v59 = vpack.c.bf16 %v1175_v28, %v1174_v6  ;;  %v1171_v25 = vmul.f32 %v2071_v7, %v2652_v48  ;;  %v3083_v48 = vld [vmem:[#allocation10_spill] sm:$0xff]  ;;  %v3085_v52 = vld [vmem:[#allocation25_spill] sm:$0xff] }
 0x284   : > { %v1170_v17 = vmul.f32 %v2071_v7, %v3080_v38  ;;  %1420 = vst [vmem:[%s2764_s4 + $0x20] sm:$0xff] %v1808_v54  ;;  %v1806_v1 = vpack.c.bf16 %v1165_v50, %v1164_v51  ;;  %v2073_v31 = vpop.eup %2072 }
 0x285   : > { %1468 = vmatprep.subr.bf16.mxu1 %v1231_v45  ;;  %1423 = vst [vmem:[%s2764_s4 + $0x38] sm:$0xff] %v1811_v59  ;;  %v1229_v30 = vpack.c.bf16 %v1171_v25, %v1169_v15  ;;  %v2075_v37 = vpop.eup %2074  ;;  %v1161_v57 = vmul.f32 %v2073_v31, %v3081_v5  ;;  %v1160_v27 = vmul.f32 %v2073_v31, %v3082_v36 }
 0x286   : > { %1469 = vmatpush1.bf16.xpose.msra.mxu1 %v1230_v63  ;;  %v1809_v40 = vpack.c.bf16 %v1171_v25, %v1170_v17  ;;  %1418 = vst [vmem:[%s2764_s4 + $0x10] sm:$0xff] %v1806_v1  ;;  %v1167_v61 = vmul.f32 %v2075_v37, %v3083_v48  ;;  %v1166_v18 = vmul.f32 %v2075_v37, %v3084_v46 }
 0x287   : > { %1470 = vmatprep.subr.bf16.mxu1 %v1229_v30  ;;  %v1804_v49 = vpack.c.bf16 %v1161_v57, %v1160_v27  ;;  %v1228_v24 = vpack.c.bf16 %v1170_v17, %v1168_v44 }
 0x288   : > { %1421 = vst [vmem:[%s2764_s4 + $0x28] sm:$0xff] %v1809_v40  ;;  %v1807_v9 = vpack.c.bf16 %v1167_v61, %v1166_v18  ;;  %v1227_v15 = vpack.c.bf16 %v1167_v61, %v1165_v50  ;;  %v1226_v54 = vpack.c.bf16 %v1166_v18, %v1164_v51 }
 0x289   : > { %v2077_v2 = vpop.eup %2076  ;;  %1416 = vst [vmem:[%s2764_s4] sm:$0xff] %v1804_v49 }
 0x28a   : > { %v1124_v19 = vpop.xlane.xlu0 %1123  ;;  %v1163_v62 = vmul.f32 %v2077_v2, %v3085_v52  ;;  %v1162_v35 = vmul.f32 %v2077_v2, %v3086_v10  ;;  %1419 = vst [vmem:[%s2764_s4 + $0x18] sm:$0xff] %v1807_v9  ;;  %v3088_v52 = vld [vmem:[#allocation20_spill] sm:$0xff]  ;;  %v3089_v10 = vld [vmem:[#allocation21_spill] sm:$0xff] }
 0x28b   : > { %2078 = vrcp.f32 %v1124_v19  ;;  %v3087_v19 = vld [vmem:[#allocation23_spill] sm:$0xff] }
 0x28c   : > { %v1805_v11 = vpack.c.bf16 %v1163_v62, %v1162_v35  ;;  %v1225_v45 = vpack.c.bf16 %v1163_v62, %v1161_v57  ;;  %v1224_v51 = vpack.c.bf16 %v1162_v35, %v1160_v27  ;;  %v2878_v57 = vld.sshfl [vmem:[%s359_s9] sm:$0x33 pattern:$0x76325410]  ;;  %v3090_v35 = vld [vmem:[#allocation18_spill] sm:$0xff] }
 0x28e   : > { %v1118_v8 = vpop.xlane.xlu0 %1117  ;;  %1471 = vmatpush1.bf16.xpose.msra.mxu1 %v1228_v24  ;;  %1417 = vst [vmem:[%s2764_s4 + $0x8] sm:$0xff] %v1805_v11 }
 0x28f   : > { %2080 = vrcp.f32 %v1118_v8  ;;  %1472 = vmatprep.subr.bf16.mxu1 %v1227_v15  ;;  %v3091_v8 = vld [vmem:[#allocation14_spill] sm:$0xff] }
 0x290   : > { %v1127_v28 = vpop.xlane.xlu1 %1126 }
 0x291   : > { %2082 = vrcp.f32 %v1127_v28 }
 0x292   : > { %v1112_v6 = vpop.xlane.xlu0 %1111 }
 0x293   : > { %2084 = vrcp.f32 %v1112_v6  ;;  %v3092_v6 = vld [vmem:[#allocation22_spill] sm:$0xff] }
 0x294   : > { %v1121_v7 = vpop.xlane.xlu1 %1120 }
 0x295   : > { %2086 = vrcp.f32 %v1121_v7 }
 0x296   : > { %v1106_v63 = vpop.xlane.xlu0 %1105  ;;  %1473 = vmatpush1.bf16.xpose.msra.mxu1 %v1226_v54 }
 0x297   : > { %2088 = vrcp.f32 %v1106_v63  ;;  %1474 = vmatprep.subr.bf16.mxu1 %v1225_v45 }
 0x298   : > { %v2079_v44 = vpop.eup %2078  ;;  %v1115_v50 = vpop.xlane.xlu1 %1114 }
 0x299   : > { %2090 = vrcp.f32 %v1115_v50  ;;  %v1221_v59 = vmul.f32 %v2079_v44, %v2702_v55  ;;  %v1220_v25 = vmul.f32 %v2079_v44, %v2700_v53 }
 0x29b   : > { %v1834_v38 = vpack.c.bf16 %v1221_v59, %v1220_v25 }
 0x29c   : > { %v2081_v17 = vpop.eup %2080  ;;  %v1109_v1 = vpop.xlane.xlu1 %1108 }
 0x29d   : > { %2092 = vrcp.f32 %v1109_v1  ;;  %1446 = vst [vmem:[%s2764_s4 + $0xf0] sm:$0xff] %v1834_v38  ;;  %v1217_v31 = vmul.f32 %v2081_v17, %v2708_v34  ;;  %v1216_v30 = vmul.f32 %v2081_v17, %v2706_v21 }
 0x29e   : > { %v2083_v37 = vpop.eup %2082  ;;  %1475 = vmatpush1.bf16.xpose.msra.mxu1 %v1224_v51 }
 0x29f   : > { %v1223_v40 = vmul.f32 %v2083_v37, %v2714_v20  ;;  %v1222_v55 = vmul.f32 %v2083_v37, %v2710_v23  ;;  %v1832_v5 = vpack.c.bf16 %v1217_v31, %v1216_v30  ;;  %v1457_v23 = vcombine.high %v2878_v57, %v2878_v57 }
 0x2a0   : > { %v2085_v53 = vpop.eup %2084 }
 0x2a1   : > { %v1255_v36 = vpack.c.bf16 %v1223_v40, %v1221_v59  ;;  %v1835_v34 = vpack.c.bf16 %v1223_v40, %v1222_v55  ;;  %1444 = vst [vmem:[%s2764_s4 + $0xe0] sm:$0xff] %v1832_v5  ;;  %v1213_v21 = vmul.f32 %v2085_v53, %v2720_v39  ;;  %v1212_v20 = vmul.f32 %v2085_v53, %v2716_v56 }
 0x2a2   : > { %v2087_v27 = vpop.eup %2086  ;;  %v1254_v48 = vpack.c.bf16 %v1222_v55, %v1220_v25  ;;  %1492 = vmatprep.mubr.bf16.mxu1 %v1457_v23 }
 0x2a3   : > { %1476 = vmatprep.subr.bf16.mxu1 %v1255_v36  ;;  %1447 = vst [vmem:[%s2764_s4 + $0xf8] sm:$0xff] %v1835_v34  ;;  %v1219_v61 = vmul.f32 %v2087_v27, %v2726_v22  ;;  %v1218_v46 = vmul.f32 %v2087_v27, %v2722_v43  ;;  %v1830_v49 = vpack.c.bf16 %v1213_v21, %v1212_v20 }
 0x2a4   : > { %v2089_v18 = vpop.eup %2088 }
 0x2a5   : > { %v1253_v39 = vpack.c.bf16 %v1219_v61, %v1217_v31  ;;  %v1833_v2 = vpack.c.bf16 %v1219_v61, %v1218_v46  ;;  %v1209_v56 = vmul.f32 %v2089_v18, %v3087_v19  ;;  %1442 = vst [vmem:[%s2764_s4 + $0xd0] sm:$0xff] %v1830_v49  ;;  %v1208_v62 = vmul.f32 %v2089_v18, %v3088_v52 }
 0x2a6   : > { %v2091_v9 = vpop.eup %2090  ;;  %1477 = vmatpush2.bf16.xpose.msra.mxu1 %v1254_v48  ;;  %v1252_v54 = vpack.c.bf16 %v1218_v46, %v1216_v30 }
 0x2a7   : > { %1445 = vst [vmem:[%s2764_s4 + $0xe8] sm:$0xff] %v1833_v2  ;;  %v1215_v22 = vmul.f32 %v2091_v9, %v3089_v10  ;;  %v1214_v43 = vmul.f32 %v2091_v9, %v3090_v35  ;;  %1478 = vmatprep.subr.bf16.mxu1 %v1253_v39  ;;  %v1828_v24 = vpack.c.bf16 %v1209_v56, %v1208_v62 }
 0x2a9   : > { %v1831_v11 = vpack.c.bf16 %v1215_v22, %v1214_v43  ;;  %1440 = vst [vmem:[%s2764_s4 + $0xc0] sm:$0xff] %v1828_v24  ;;  %v1251_v63 = vpack.c.bf16 %v1215_v22, %v1213_v21  ;;  %v1250_v44 = vpack.c.bf16 %v1214_v43, %v1212_v20 }
 0x2aa   : > { %v2093_v15 = vpop.eup %2092 }
 0x2ab   : > { %1443 = vst [vmem:[%s2764_s4 + $0xd8] sm:$0xff] %v1831_v11  ;;  %v1211_v28 = vmul.f32 %v2093_v15, %v3091_v8  ;;  %v1210_v7 = vmul.f32 %v2093_v15, %v3092_v6 }
 0x2ad   : > { %v1829_v45 = vpack.c.bf16 %v1211_v28, %v1210_v7  ;;  %v1249_v50 = vpack.c.bf16 %v1211_v28, %v1209_v56  ;;  %v1248_v59 = vpack.c.bf16 %v1210_v7, %v1208_v62 }
 0x2ae   : > { %1479 = vmatpush2.bf16.xpose.msra.mxu1 %v1252_v54 }
 0x2af   : > { %1441 = vst [vmem:[%s2764_s4 + $0xc8] sm:$0xff] %v1829_v45  ;;  %1480 = vmatprep.subr.bf16.mxu1 %v1251_v63 }
 0x2b6   : > { %1481 = vmatpush2.bf16.xpose.msra.mxu1 %v1250_v44 }
 0x2b7   : > { %1482 = vmatprep.subr.bf16.mxu1 %v1249_v50 }
 0x2be   : > { %1483 = vmatpush2.bf16.xpose.msra.mxu1 %v1248_v59 }
 0x2ed   : > { %v1100_v25 = vpop.xlane.xlu0 %1099 }
 0x2ee   : > { %2094 = vrcp.f32 %v1100_v25 }
 0x2f1   : > { %v1103_v38 = vpop.xlane.xlu1 %1102 }
 0x2f2   : > { %2096 = vrcp.f32 %v1103_v38 }
 0x2f5   : > { %v1094_v17 = vpop.xlane.xlu0 %1093 }
 0x2f6   : > { %2098 = vrcp.f32 %v1094_v17 }
 0x2f9   : > { %v1097_v1 = vpop.xlane.xlu1 %1096 }
 0x2fa   : > { %2100 = vrcp.f32 %v1097_v1 }
 0x2fb   : > { %v2095_v51 = vpop.eup %2094 }
 0x2fc   : > { %v1205_v31 = vmul.f32 %v2095_v51, %v2771_v0  ;;  %v1204_v30 = vmul.f32 %v2095_v51, %v2769_v16 }
 0x2fd   : > { %v1088_v37 = vpop.xlane.xlu0 %1087 }
 0x2fe   : > { %2102 = vrcp.f32 %v1088_v37  ;;  %v1826_v40 = vpack.c.bf16 %v1205_v31, %v1204_v30 }
 0x2ff   : > { %v2097_v55 = vpop.eup %2096 }
 0x300   : > { %v1207_v5 = vmul.f32 %v2097_v55, %v2782_v32  ;;  %v1206_v53 = vmul.f32 %v2097_v55, %v2779_v26  ;;  %1438 = vst [vmem:[%s2764_s4 + $0xb0] sm:$0xff] %v1826_v40 }
 0x302   : > { %v1091_v36 = vpop.xlane.xlu1 %1090  ;;  %v1247_v34 = vpack.c.bf16 %v1207_v5, %v1205_v31  ;;  %v1246_v21 = vpack.c.bf16 %v1206_v53, %v1204_v30  ;;  %v1827_v27 = vpack.c.bf16 %v1207_v5, %v1206_v53 }
 0x303   : > { %2104 = vrcp.f32 %v1091_v36  ;;  %v2099_v20 = vpop.eup %2098 }
 0x304   : > { %1484 = vmatprep.subr.bf16.mxu1 %v1247_v34  ;;  %1439 = vst [vmem:[%s2764_s4 + $0xb8] sm:$0xff] %v1827_v27  ;;  %v1201_v16 = vmul.f32 %v2099_v20, %v2793_v13  ;;  %v1200_v0 = vmul.f32 %v2099_v20, %v2789_v42 }
 0x305   : > { %v1082_v23 = vpop.xlane.xlu0 %1081  ;;  %1485 = vmatpush2.bf16.xpose.msra.mxu1 %v1246_v21 }
 0x306   : > { %2106 = vrcp.f32 %v1082_v23  ;;  %v1824_v32 = vpack.c.bf16 %v1201_v16, %v1200_v0 }
 0x307   : > { %v2101_v26 = vpop.eup %2100 }
 0x308   : > { %v1203_v48 = vmul.f32 %v2101_v26, %v2804_v3  ;;  %v1202_v61 = vmul.f32 %v2101_v26, %v2800_v29  ;;  %1436 = vst [vmem:[%s2764_s4 + $0xa0] sm:$0xff] %v1824_v32 }
 0x30a   : > { %v1085_v46 = vpop.xlane.xlu1 %1084  ;;  %v1245_v18 = vpack.c.bf16 %v1203_v48, %v1201_v16  ;;  %v1244_v49 = vpack.c.bf16 %v1202_v61, %v1200_v0  ;;  %v1825_v39 = vpack.c.bf16 %v1203_v48, %v1202_v61 }
 0x30b   : > { %2108 = vrcp.f32 %v1085_v46  ;;  %v2103_v13 = vpop.eup %2102 }
 0x30c   : > { %1486 = vmatprep.subr.bf16.mxu1 %v1245_v18  ;;  %1437 = vst [vmem:[%s2764_s4 + $0xa8] sm:$0xff] %v1825_v39  ;;  %v1197_v42 = vmul.f32 %v2103_v13, %v2813_v33  ;;  %v1196_v2 = vmul.f32 %v2103_v13, %v2810_v60 }
 0x30d   : > { %1487 = vmatpush2.bf16.xpose.msra.mxu1 %v1244_v49 }
 0x30e   : > { %v1822_v19 = vpack.c.bf16 %v1197_v42, %v1196_v2 }
 0x310   : > { %v2105_v3 = vpop.eup %2104  ;;  %1434 = vst [vmem:[%s2764_s4 + $0x90] sm:$0xff] %v1822_v19 }
 0x311   : > { %v1199_v29 = vmul.f32 %v2105_v3, %v2822_v58  ;;  %v1198_v56 = vmul.f32 %v2105_v3, %v2820_v14 }
 0x313   : > { %v1243_v9 = vpack.c.bf16 %v1199_v29, %v1197_v42  ;;  %v1242_v52 = vpack.c.bf16 %v1198_v56, %v1196_v2  ;;  %v1823_v62 = vpack.c.bf16 %v1199_v29, %v1198_v56  ;;  %v2107_v10 = vpop.eup %2106 }
 0x314   : > { %v1193_v33 = vmul.f32 %v2107_v10, %v2831_v47  ;;  %v1192_v60 = vmul.f32 %v2107_v10, %v2829_v12 }
 0x315   : > { %1488 = vmatprep.subr.bf16.mxu1 %v1243_v9  ;;  %1435 = vst [vmem:[%s2764_s4 + $0x98] sm:$0xff] %v1823_v62 }
 0x316   : > { %1489 = vmatpush2.bf16.xpose.msra.mxu1 %v1242_v52  ;;  %v1820_v22 = vpack.c.bf16 %v1193_v33, %v1192_v60 }
 0x318   : > { %v2109_v58 = vpop.eup %2108  ;;  %1432 = vst [vmem:[%s2764_s4 + $0x80] sm:$0xff] %v1820_v22 }
 0x319   : > { %v1195_v14 = vmul.f32 %v2109_v58, %v2840_v4  ;;  %v1194_v35 = vmul.f32 %v2109_v58, %v2838_v41 }
 0x31b   : > { %v1241_v43 = vpack.c.bf16 %v1195_v14, %v1193_v33  ;;  %v1240_v24 = vpack.c.bf16 %v1194_v35, %v1192_v60  ;;  %v1821_v11 = vpack.c.bf16 %v1195_v14, %v1194_v35 }
 0x31d   : > { %1490 = vmatprep.subr.bf16.mxu1 %v1241_v43  ;;  %1433 = vst [vmem:[%s2764_s4 + $0x88] sm:$0xff] %v1821_v11  ;;  %s2116_s4 = scalar_lea.vmem %s2115_s22, 8192 }
 0x31e   : > { %1491 = vmatpush2.bf16.xpose.msra.mxu1 %v1240_v24  ;;  %p2118_p2 = scmp.lt.s32.totalorder %s2116_s4, %s2110_s19 }
 0x320   : > { %p2119_p3 = por %p2118_p2, %p2117_p1 }
 0x322   : > { %p2120_p5 = pnand %p2119_p3, %p2113_p0 }
 0x325   : > { %1493 = vmatmul.mubr.bf16.vlgmr.msra.gmra.mxu1 %v2878_v57 }
 0x326   : > { %2123 = shalt.err (!%p2120_p5)
}
 0x327   : > { %s2124_s29 = scalar_lea.hbm %s2929_s17, 4096  ;;  %s2128_s13 = scalar_lea.hbm %s3006_s6, 8192 }
 0x328   : > { %p2125_p6 = scmp.ne.s32.totalorder %s2929_s17, %s2124_s29  ;;  %p2129_p10 = scmp.lt.s32.totalorder %s2929_s17, %s3006_s6 }
 0x329   : > { %p2130_p11 = scmp.lt.s32.totalorder %s2128_s13, %s2124_s29 }
 0x32a   : > { %p2126_p7 = pnand %p2125_p6, %p2301_p4 }
 0x32b   : > { %p2131_p12 = por %p2130_p11, %p2129_p10 }
 0x32c   : > { %p2127_p9 = pneg %p2126_p7 }
 0x32e   : > { %p2132_p13 = pnand %p2131_p12, %p2127_p9 }
 0x330   : > { %2135 = shalt.err (!%p2132_p13)
}
 0x331   : > { %s2220_s19 = smov 128   ;;  %s2221_s20 = smov 8  }
 0x332   : > { %1839 = dma.vmem_to_hbm [thread:$0]  (%p2301_p4), %s2931_s14, 4096, %s2929_s17, %s1522_s18, %s2220_s19, %s2220_s19, %s2221_s20  }
 0x333   : > { %s1501_s22 = sld [smem:[#allocation2]]  ;;  %s1803_s4 = sshll.u32 %s2318_s12, 3 }
 0x334   : > { %s368_s29 = scalar_lea.vmem %s3003_s3, %s1803_s4  ;;  %s1715_s13 = sshll.u32 %s2753_s21, 3 }
 0x335   : > { %v1505_v47 = vld [vmem:[%s368_s29] sm:$0xff]  ;;  %s1836_s15 = sshll.u32 %s2208_s26, 7  ;;  %s332_s16 = scalar_lea.vmem [#allocation3], %s1715_s13 }
 0x336   : > { %v1507_v57 = vcombine.high %v1505_v47, %v1505_v47  ;;  %s1538_s14 = sshll.u32 %s332_s16, 4  ;;  %s1536_s18 = scalar_lea.hbm %s3005_s5, %s1836_s15  ;;  %s1539_s14 = int_to_ptr.vmem [resolvable:$true] %s1538_s14 }
 0x337   : > { %s1517_s19 = scalar_lea.sflag [#allocation4], %s2753_s21  ;;  %s2136_s20 = scalar_lea.vmem %s1539_s14, 128 }
 0x338   : > { %p2137_p0 = scmp.ne.s32.totalorder %s1539_s14, %s2136_s20 }
 0x339   : > { %v1502_v12 = vstv %s1501_s22  ;;  %s2222_s22 = smov [#allocation3]  }
 0x33a   : > { %p2138_p1 = pnand %p2137_p0, %p2301_p4  ;;  %s2140_s26 = sshll.u32 %s2222_s22, 4  ;;  %s2141_s26 = int_to_ptr.vmem [resolvable:$false] %s2140_s26 }
 0x33b   : > { %s2142_s4 = scalar_lea.vmem %s2141_s26, 256  ;;  %p2143_p3 = scmp.lt.s32.totalorder %s1539_s14, %s2141_s26 }
 0x33c   : > { %p2139_p2 = pneg %p2138_p1  ;;  %p2144_p5 = scmp.lt.s32.totalorder %s2142_s4, %s2136_s20 }
 0x33e   : > { %p2145_p6 = por %p2144_p5, %p2143_p3 }
 0x340   : > { %p2146_p7 = pnand %p2145_p6, %p2139_p2 }
 0x3e5   : > { %v1494_v41 = vpop.f32.mrf.mxu1 }
 0x3e6   : > { %v1503_v4 = vmul.f32 %v1502_v12, %v1494_v41 }
 0x3e7   : > { %v1496_v15 = vpop.f32.mrf.mxu1 }
 0x3e8   : > { %v1504_v8 = vmul.f32 %v1502_v12, %v1496_v15  ;;  %v1509_v6 = vadd.f32 %v1505_v47, %v1503_v4 }
 0x3e9   : > { %v1498_v28 = vpop.f32.mrf.mxu1 }
 0x3ea   : > { %v1510_v7 = vadd.f32 %v1507_v57, %v1504_v8 }
 0x3eb   : > { %v1499_v54 = vpop.f32.mrf.mxu1 }
 0x3ec   : > { %v1513_v45 = vcombine.low %v1509_v6, %v1510_v7 }
 0x3ee   : > { %1515 = vst [vmem:[%s332_s16] sm:$0xff] %v1513_v45 }
 0x3ef   : > { %2149 = shalt.err (!%p2146_p7)
}
 0x3f0   : > { %s2150_s7 = scalar_lea.hbm %s1536_s18, 128  ;;  %s2154_s29 = scalar_lea.hbm %s3005_s5, 256 }
 0x3f1   : > { %p2151_p9 = scmp.ne.s32.totalorder %s1536_s18, %s2150_s7  ;;  %p2155_p12 = scmp.lt.s32.totalorder %s1536_s18, %s3005_s5 }
 0x3f2   : > { %p2156_p13 = scmp.lt.s32.totalorder %s2154_s29, %s2150_s7 }
 0x3f3   : > { %p2152_p10 = pnand %p2151_p9, %p2301_p4 }
 0x3f4   : > { %p2157_p0 = por %p2156_p13, %p2155_p12 }
 0x3f5   : > { %p2153_p11 = pneg %p2152_p10 }
 0x3f7   : > { %p2158_p1 = pnand %p2157_p0, %p2153_p11 }
 0x3f9   : > { %2161 = shalt.err (!%p2158_p1)
}
 0x3fa   : > { %1838 = dma.vmem_to_hbm [thread:$0]  (%p2301_p4), %s1539_s14, 128, %s1536_s18, %s1517_s19  }
 0x3fb PF: > { %p1849_p2 = scmp.ge.s32.totalorder %s2216_s28, 2  ;;  %s1569_s16 = sand.u32 1, %s2196_s23  }
 0x3fc   : > { %s1570_s12 = scalar_lea.sflag [#allocation4], %s1569_s16 }
 0x3fd   : > { %p1843_p3 = pnand %p1849_p2, %p2308_p8 }
 0x3ff   : > { %p1844_p5 = pneg %p1843_p3 }
 0x401   : > { %2187 = dma.done.wait (%p1844_p5), %s1570_s12, 128  }
 0x402   : > { %2189 = vsyncadd (%p1844_p5), %s1570_s12, 4294967168  ;;  %s1579_s17 = scalar_lea.sflag [#allocation6], %s1569_s16 }
 0x403   : > { %2191 = dma.done.wait (%p1844_p5), %s1579_s17, 4096  }
 0x404   : > { %2193 = vsyncadd (%p1844_p5), %s1579_s17, 4294963200  ;;  %s24_s28 = sadd.s32 1, %s2216_s28   ;;  %s3093_s23 = smov %s2200_s24 }
 0x405   : > { %p21_p6 = scmp.ge.s32.totalorder %s24_s28, 4   ;;  %s3094_s24 = smov %s2204_s25 }
 0x406   : > { %s3095_s25 = smov %s2314_s11  ;;  %s3096_s26 = smov %s2212_s27 }
 0x407   : > { %s3097_s27 = smov %s3099_s30  ;;  %23 = sbr.rel (!%p21_p6) target bundleno = 8 (0x8), region = 101 }
 0x40c   :  { %1584 = vsyncpa [#allocation4], 1 }
 0x40d   :  { %1586 = vsyncpa [#allocation4 + $0x1], 1 }
 0x40e   :  { %1587 = vsyncpa [#allocation6], 1 }
 0x40f   :  { %1589 = vsyncpa [#allocation6 + $0x1], 1 }

</bundles_post_ra>
